<compile_context>
chip_gen: v6e
topology: v6e:2x2x1
jax: 0.10.0
libtpu: 0.0.40
codegen_flags: <defaults>
</compile_context>

<pallas_src>
import functools

import numpy as np
import jax
import jax.numpy as jnp
from jax import lax
from jax.experimental import pallas as pl
from jax.experimental.pallas import tpu as pltpu


def _fmix32(x):
    """murmur3-style 32-bit avalanche (uint32 in -> uint32 out)."""
    x = x ^ (x >> jnp.uint32(16))
    x = x * jnp.uint32(0x7FEB352D)
    x = x ^ (x >> jnp.uint32(15))
    x = x * jnp.uint32(0x846CA68B)
    x = x ^ (x >> jnp.uint32(16))
    return x


def _prob_gauss_mix_kernel(seed_ref, x_ref, w_ref, o_ref, *, eps, tm, tn, m_pad):
    jm = pl.program_id(0)   # m-tile index   (slow axis: W tile stays VMEM-resident)
    ib = pl.program_id(1)   # batch-tile idx (fast axis)

    # ---- MXU: mu = x @ W.T  (bf16 inputs, f32 accumulate, no HBM transpose) ----
    x_bf = x_ref[...].astype(jnp.bfloat16)          # (tm, n)
    w_bf = w_ref[...].astype(jnp.bfloat16)          # (tn, n), native Linear layout
    mu = lax.dot_general(
        x_bf, w_bf,
        dimension_numbers=(((1,), (1,)), ((), ())),
        preferred_element_type=jnp.float32)         # (tm, tn)

    # ---- Gaussian noise: counter-based hash + paired Box-Muller ----
    # Deterministic in (seed, global element index); the cos/sin pair is applied
    # to the two sublane halves of the tile -> 2 transcendentals per element.
    h = tm // 2
    seed_u = seed_ref[0].astype(jnp.uint32)

    row = lax.broadcasted_iota(jnp.int32, (h, tn), 0).astype(jnp.uint32)
    col = lax.broadcasted_iota(jnp.int32, (h, tn), 1).astype(jnp.uint32)
    row = row + (ib * tm).astype(jnp.uint32)
    col = col + (jm * tn).astype(jnp.uint32)
    idx = row * jnp.uint32(m_pad) + col                       # global element index
    base = idx * jnp.uint32(2) + seed_u * jnp.uint32(0x9E3779B9)

    b1 = _fmix32(base)
    b2 = _fmix32(base + jnp.uint32(1))
    scale = np.float32(1.0 / (1 << 24))
    u1 = 1.0 - (b1 >> jnp.uint32(8)).astype(jnp.int32).astype(jnp.float32) * scale  # (0, 1]
    u2 = (b2 >> jnp.uint32(8)).astype(jnp.int32).astype(jnp.float32) * scale        # [0, 1)

    r = jnp.sqrt(-2.0 * jnp.log(u1))
    t = np.float32(2.0 * np.pi) * u2
    z = jnp.concatenate([r * jnp.cos(t), r * jnp.sin(t)], axis=0)   # (tm, tn)

    o_ref[...] = (mu + np.float32(eps) * z).astype(o_ref.dtype)


def prob_gauss_mix_forward(x, w, eps, seed, *, tm=128, tn=128):
    """x: (B, n) f32; w: (m, n) f32 (PyTorch nn.Linear layout); seed: python int."""
    B, n = x.shape
    m, n2 = w.shape
    assert n == n2, "weight inner dim must match x feature dim"

    # Pad batch / output-feature dims up to tile multiples (lane/sublane friendly).
    B_pad = ((B + tm - 1) // tm) * tm
    m_pad = ((m + tn - 1) // tn) * tn
    if B_pad != B:
        x = jnp.pad(x, ((0, B_pad - B), (0, 0)))
    if m_pad != m:
        w = jnp.pad(w, ((0, m_pad - m), (0, 0)))

    grid_m = m_pad // tn
    grid_b = B_pad // tm

    seed_arr = jnp.asarray([seed], dtype=jnp.int32)
    kernel = functools.partial(
        _prob_gauss_mix_kernel, eps=float(eps), tm=tm, tn=tn, m_pad=m_pad)

    cost = pl.CostEstimate(
        flops=2 * B_pad * n * m_pad,
        transcendentals=2 * B_pad * m_pad,
        bytes_accessed=4 * (B_pad * n + n * m_pad + B_pad * m_pad),
    )

    out = pl.pallas_call(
        kernel,
        out_shape=jax.ShapeDtypeStruct((B_pad, m_pad), jnp.float32),
        grid_spec=pltpu.PrefetchScalarGridSpec(
            num_scalar_prefetch=1,                 # seed lands in SMEM
            grid=(grid_m, grid_b),                 # weight index changes slowest
            in_specs=[
                pl.BlockSpec((tm, n), lambda jm, ib, seed: (ib, 0)),   # x tile
                pl.BlockSpec((tn, n), lambda jm, ib, seed: (jm, 0)),   # W tile (resident over batch axis)
            ],
            out_specs=pl.BlockSpec((tm, tn), lambda jm, ib, seed: (ib, jm)),
        ),
        compiler_params=pltpu.CompilerParams(
            dimension_semantics=("parallel", "parallel"),   # lets v7x use both TCs
            vmem_limit_bytes=32 * 1024 * 1024,
        ),
        cost_estimate=cost,
    )(seed_arr, x, w)

    return out[:B, :m]


if __name__ == "__main__":
    # Small-but-tileable shapes consistent with nn.Linear(n, m): x is (batch, n).
    batch, n, m = 256, 128, 256
    eps = 0.1

    key = jax.random.PRNGKey(0)
    kx, kw = jax.random.split(key)
    x = jax.random.normal(kx, (batch, n), dtype=jnp.float32)
    # Deterministic PyTorch-style Linear init: U(-1/sqrt(n), 1/sqrt(n)), shape (m, n)
    bound = 1.0 / float(np.sqrt(n))
    w = jax.random.uniform(kw, (m, n), dtype=jnp.float32, minval=-bound, maxval=bound)

    out = prob_gauss_mix_forward(x, w, eps, seed=1234)
    out = jax.block_until_ready(out)

    # Sanity checks: shape, finiteness, and noise statistics around the exact mean.
    mu_ref = x @ w.T
    assert out.shape == (batch, m)
    assert bool(jnp.all(jnp.isfinite(out)))
    resid = out - mu_ref
    resid_std = float(jnp.std(resid))
    resid_mean = float(jnp.mean(resid))
    assert 0.05 < resid_std < 0.3, f"unexpected noise std {resid_std}"
    assert abs(resid_mean) < 0.02, f"unexpected noise mean {resid_mean}"

    print("KERNEL_OK")
</pallas_src>

<mosaic_0001>
module attributes {stable_mosaic.version = 11 : i64} {
  func.func @_prob_gauss_mix_kernel(%arg0: i32, %arg1: i32, %arg2: memref<1xi32, #tpu.memory_space<smem>>, %arg3: memref<128x128xf32, #tpu.memory_space<vmem>>, %arg4: memref<128x128xf32, #tpu.memory_space<vmem>>, %arg5: memref<128x128xf32, #tpu.memory_space<vmem>>) attributes {dimension_semantics = [#tpu.dimension_semantics<parallel>, #tpu.dimension_semantics<parallel>], iteration_bounds = array<i64: 2, 2>, scalar_prefetch = 1 : i64, scratch_operands = 0 : i64, tpu.core_type = #tpu.core_type<tc>, window_params = [{transform_indices = @transform_0, window_bounds = array<i64: 128, 128>}, {transform_indices = @transform_1, window_bounds = array<i64: 128, 128>}, {transform_indices = @transform_2, window_bounds = array<i64: 128, 128>}]} {
    %c0 = arith.constant 0 : index
    %c0_0 = arith.constant 0 : index
    %0 = vector.load %arg3[%c0, %c0_0] : memref<128x128xf32, #tpu.memory_space<vmem>>, vector<128x128xf32>
    %1 = arith.truncf %0 : vector<128x128xf32> to vector<128x128xbf16>
    %c0_1 = arith.constant 0 : index
    %c0_2 = arith.constant 0 : index
    %2 = vector.load %arg4[%c0_1, %c0_2] : memref<128x128xf32, #tpu.memory_space<vmem>>, vector<128x128xf32>
    %3 = arith.truncf %2 : vector<128x128xf32> to vector<128x128xbf16>
    %cst = arith.constant dense<0.000000e+00> : vector<128x128xf32>
    %4 = tpu.matmul %1, %3, %cst {dimension_numbers = #tpu.dot_dimension_numbers<[1], [1], [0], [0], [0, 0, 1, 0], [], []>} : vector<128x128xbf16>, vector<128x128xbf16>, vector<128x128xf32> -> vector<128x128xf32>
    %c0_3 = arith.constant 0 : index
    %5 = memref.load %arg2[%c0_3] : memref<1xi32, #tpu.memory_space<smem>>
    %6 = tpu.iota {dimensions = array<i32: 0>} : vector<64x128xi32>
    %7 = tpu.iota {dimensions = array<i32: 1>} : vector<64x128xi32>
    %c128_i32 = arith.constant 128 : i32
    %8 = arith.muli %arg1, %c128_i32 : i32
    %9 = vector.broadcast %8 : i32 to vector<64x128xi32>
    %10 = arith.addi %6, %9 : vector<64x128xi32>
    %c128_i32_4 = arith.constant 128 : i32
    %11 = arith.muli %arg0, %c128_i32_4 : i32
    %12 = vector.broadcast %11 : i32 to vector<64x128xi32>
    %13 = arith.addi %7, %12 : vector<64x128xi32>
    %c256_i32 = arith.constant 256 : i32
    %14 = vector.broadcast %c256_i32 : i32 to vector<64x128xi32>
    %15 = arith.muli %10, %14 : vector<64x128xi32>
    %16 = arith.addi %15, %13 : vector<64x128xi32>
    %c2_i32 = arith.constant 2 : i32
    %17 = vector.broadcast %c2_i32 : i32 to vector<64x128xi32>
    %18 = arith.muli %16, %17 : vector<64x128xi32>
    %c-1640531527_i32 = arith.constant -1640531527 : i32
    %19 = arith.muli %5, %c-1640531527_i32 : i32
    %20 = vector.broadcast %19 : i32 to vector<64x128xi32>
    %21 = arith.addi %18, %20 : vector<64x128xi32>
    %c16_i32 = arith.constant 16 : i32
    %22 = vector.broadcast %c16_i32 : i32 to vector<64x128xi32>
    %23 = arith.shrui %21, %22 : vector<64x128xi32>
    %24 = arith.xori %21, %23 : vector<64x128xi32>
    %c2146121005_i32 = arith.constant 2146121005 : i32
    %25 = vector.broadcast %c2146121005_i32 : i32 to vector<64x128xi32>
    %26 = arith.muli %24, %25 : vector<64x128xi32>
    %c15_i32 = arith.constant 15 : i32
    %27 = vector.broadcast %c15_i32 : i32 to vector<64x128xi32>
    %28 = arith.shrui %26, %27 : vector<64x128xi32>
    %29 = arith.xori %26, %28 : vector<64x128xi32>
    %c-2073254261_i32 = arith.constant -2073254261 : i32
    %30 = vector.broadcast %c-2073254261_i32 : i32 to vector<64x128xi32>
    %31 = arith.muli %29, %30 : vector<64x128xi32>
    %c16_i32_5 = arith.constant 16 : i32
    %32 = vector.broadcast %c16_i32_5 : i32 to vector<64x128xi32>
    %33 = arith.shrui %31, %32 : vector<64x128xi32>
    %34 = arith.xori %31, %33 : vector<64x128xi32>
    %c1_i32 = arith.constant 1 : i32
    %35 = vector.broadcast %c1_i32 : i32 to vector<64x128xi32>
    %36 = arith.addi %21, %35 : vector<64x128xi32>
    %c16_i32_6 = arith.constant 16 : i32
    %37 = vector.broadcast %c16_i32_6 : i32 to vector<64x128xi32>
    %38 = arith.shrui %36, %37 : vector<64x128xi32>
    %39 = arith.xori %36, %38 : vector<64x128xi32>
    %c2146121005_i32_7 = arith.constant 2146121005 : i32
    %40 = vector.broadcast %c2146121005_i32_7 : i32 to vector<64x128xi32>
    %41 = arith.muli %39, %40 : vector<64x128xi32>
    %c15_i32_8 = arith.constant 15 : i32
    %42 = vector.broadcast %c15_i32_8 : i32 to vector<64x128xi32>
    %43 = arith.shrui %41, %42 : vector<64x128xi32>
    %44 = arith.xori %41, %43 : vector<64x128xi32>
    %c-2073254261_i32_9 = arith.constant -2073254261 : i32
    %45 = vector.broadcast %c-2073254261_i32_9 : i32 to vector<64x128xi32>
    %46 = arith.muli %44, %45 : vector<64x128xi32>
    %c16_i32_10 = arith.constant 16 : i32
    %47 = vector.broadcast %c16_i32_10 : i32 to vector<64x128xi32>
    %48 = arith.shrui %46, %47 : vector<64x128xi32>
    %49 = arith.xori %46, %48 : vector<64x128xi32>
    %c8_i32 = arith.constant 8 : i32
    %50 = vector.broadcast %c8_i32 : i32 to vector<64x128xi32>
    %51 = arith.shrui %34, %50 : vector<64x128xi32>
    %52 = arith.sitofp %51 : vector<64x128xi32> to vector<64x128xf32>
    %cst_11 = arith.constant 5.96046448E-8 : f32
    %53 = vector.broadcast %cst_11 : f32 to vector<64x128xf32>
    %54 = arith.mulf %52, %53 : vector<64x128xf32>
    %cst_12 = arith.constant 1.000000e+00 : f32
    %55 = vector.broadcast %cst_12 : f32 to vector<64x128xf32>
    %56 = arith.subf %55, %54 : vector<64x128xf32>
    %c8_i32_13 = arith.constant 8 : i32
    %57 = vector.broadcast %c8_i32_13 : i32 to vector<64x128xi32>
    %58 = arith.shrui %49, %57 : vector<64x128xi32>
    %59 = arith.sitofp %58 : vector<64x128xi32> to vector<64x128xf32>
    %cst_14 = arith.constant 5.96046448E-8 : f32
    %60 = vector.broadcast %cst_14 : f32 to vector<64x128xf32>
    %61 = arith.mulf %59, %60 : vector<64x128xf32>
    %62 = math.log %56 : vector<64x128xf32>
    %cst_15 = arith.constant -2.000000e+00 : f32
    %63 = vector.broadcast %cst_15 : f32 to vector<64x128xf32>
    %64 = arith.mulf %63, %62 : vector<64x128xf32>
    %65 = math.sqrt %64 : vector<64x128xf32>
    %cst_16 = arith.constant 6.28318548 : f32
    %66 = vector.broadcast %cst_16 : f32 to vector<64x128xf32>
    %67 = arith.mulf %66, %61 : vector<64x128xf32>
    %68 = math.cos %67 : vector<64x128xf32>
    %69 = arith.mulf %65, %68 : vector<64x128xf32>
    %70 = math.sin %67 : vector<64x128xf32>
    %71 = arith.mulf %65, %70 : vector<64x128xf32>
    %72 = tpu.concatenate %69, %71 in 0 : vector<64x128xf32>, vector<64x128xf32> -> vector<128x128xf32>
    %cst_17 = arith.constant 1.000000e-01 : f32
    %73 = vector.broadcast %cst_17 : f32 to vector<128x128xf32>
    %74 = arith.mulf %73, %72 : vector<128x128xf32>
    %75 = arith.addf %4, %74 : vector<128x128xf32>
    %c0_18 = arith.constant 0 : index
    %c0_19 = arith.constant 0 : index
    %76 = vector.load %arg5[%c0_18, %c0_19] : memref<128x128xf32, #tpu.memory_space<vmem>>, vector<128x128xf32>
    tpu.vector_store %arg5[%c0_18, %c0_19], %75 {strides = array<i32>} : memref<128x128xf32, #tpu.memory_space<vmem>>, vector<128x128xf32>,
    return
  }
  func.func @transform_0(%arg0: i32, %arg1: i32, %arg2: memref<1xi32, #tpu.memory_space<smem>>) -> (i32, i32) {
    %c0_i32 = arith.constant 0 : i32
    %c0_i32_0 = arith.constant 0 : i32
    return %arg1, %c0_i32 : i32, i32
  }
  func.func @transform_1(%arg0: i32, %arg1: i32, %arg2: memref<1xi32, #tpu.memory_space<smem>>) -> (i32, i32) {
    %c0_i32 = arith.constant 0 : i32
    %c0_i32_0 = arith.constant 0 : i32
    return %arg0, %c0_i32 : i32, i32
  }
  func.func @transform_2(%arg0: i32, %arg1: i32, %arg2: memref<1xi32, #tpu.memory_space<smem>>) -> (i32, i32) {
    %c0_i32 = arith.constant 0 : i32
    return %arg1, %arg0 : i32, i32
  }
}

</mosaic_0001>

<bundles_post_ra>
// kernel: tpu_custom_call.1
= control target key start
LH: loop header
LB: loop body
LE: loop exit
PB: predicated region body
PF: predicated region fallthrough
CT: control target
= control target key end

     0   :  { %s4579_s0 = inlined_call_operand.<no memory space> [shape: s32[1], index: 0, kind: input, shape index: {}]   ;;  %s4580_s1 = inlined_call_operand.hbm [shape: f32[256,128], index: 1, kind: input, shape index: {}]   ;;  %s4581_s2 = inlined_call_operand.hbm [shape: f32[256,128], index: 2, kind: input, shape index: {}]   ;;  %s4582_s3 = inlined_call_operand.hbm [shape: f32[256,256], index: 3, kind: output, shape index: {}]  }
   0x1   :  { %4593 = sst [smem:[#allocation18_spill]] %s4580_s1 }
   0x2   :  { %4594 = sst [smem:[#allocation19_spill]] %s4581_s2 }
   0x3   :  { %8 = sst [smem:[#allocation3]] %s4579_s0 }
   0x4   :  { %9 = vsyncpa [#allocation5], 0 }
   0x5   :  { %11 = vsyncpa [#allocation5 + $0x1], 0 }
   0x6   :  { %12 = vsyncpa [#allocation8], 0 }
   0x7   :  { %14 = vsyncpa [#allocation8 + $0x1], 0 }
   0x8   :  { %15 = vsyncpa [#allocation6], 0 }
   0x9   :  { %17 = vsyncpa [#allocation6 + $0x1], 0  ;;  %s3169_s14 = smov 0   ;;  %s3171_s15 = smov 0  }
   0xa   :  { %s3173_s16 = smov 0   ;;  %s3175_s17 = smov 0  }
   0xb   :  { %s3177_s18 = smov 0   ;;  %s3179_s19 = smov 0  }
   0xc   :  { %s3181_s20 = smov 0   ;;  %s3183_s0 = smov 0  }
   0xd   :  { %s3185_s21 = smov 0   ;;  %s3187_s22 = smov 0  }
   0xe   :  { %s3189_s23 = smov 0   ;;  %s3191_s24 = smov 0  }
   0xf   :  { %s3193_s25 = smov 0   ;;  %s3195_s26 = smov 0  }
  0x10 LB: > { %4595 = sst [smem:[#allocation13_spill]] %s3122_s24  ;;  %s32_s27 = sadd.s32 1, %s3122_s24  ;;  %s3130_s26 = sphi %s3195_s26, %s23_s26   ;;  %s3126_s25 = sphi %s3193_s25, %s4637_s25   ;;  %s3122_s24 = sphi %s3191_s24, %s4647_s24   ;;  %s3118_s23 = sphi %s3189_s23, %s4635_s23   ;;  %s3114_s22 = sphi %s3187_s22, %s4634_s22   ;;  %s3110_s21 = sphi %s3185_s21, %s4646_s21   ;;  %s3106_s0 = sphi %s3183_s0, %s4645_s0   ;;  %s3102_s20 = sphi %s3181_s20, %s4644_s20   ;;  %s3098_s19 = sphi %s3179_s19, %s4643_s19   ;;  %s3094_s18 = sphi %s3177_s18, %s4642_s18   ;;  %s3090_s17 = sphi %s3175_s17, %s4641_s17   ;;  %s3086_s16 = sphi %s3173_s16, %s4640_s16   ;;  %s3082_s15 = sphi %s3171_s15, %s4639_s15   ;;  %s3078_s14 = sphi %s3169_s14, %s4638_s14  }
  0x11   : > { %4596 = sst [smem:[#allocation14_spill]] %s3126_s25  ;;  %s4583_s28 = sadd.s32 4294967295, %s3130_s26  }
  0x12   : > { %p3239_p0 = scmp.ge.s32.totalorder %s32_s27, 2  ;;  %p49_p1 = scmp.ne.s32.totalorder %s3110_s21, %s3106_s0 }
  0x13   : > { %p4586_p2 = scmp.eq.s32.totalorder %s3130_s26, 0  ;;  %s42_s30 = sadd.s32 1, %s3110_s21 }
  0x14   : > { %s4649_s27 = smov (%p3239_p0, %s32_s27), 0  ;;  %p55_p3 = scmp.ne.s32.totalorder %s3106_s0, %s3102_s20 }
  0x15   : > { %4598 = sst [smem:[#allocation15_spill]] %s4649_s27  ;;  %s3254_s4 = ssub.s32 %s3122_s24, %s4649_s27 }
  0x16   : > { %p3258_p4 = scmp.eq.s32.totalorder %s4583_s28, 0  ;;  %p40_p5 = scmp.eq.s32.totalorder %s3254_s4, 0 }
  0x17   : > { %p51_p6 = por %p4586_p2, %p49_p1  ;;  %p4588_p8 = scmp.lt.s32.totalorder %s3130_s26, 4 }
  0x18   : > { %p3267_p7 = por %p3258_p4, %p55_p3  ;;  %s133_s8 = sand.u32 1, %s3110_s21  }
  0x19   : > { %s3272_s7 = scalar_select %p40_p5, %s3110_s21, %s42_s30  }
  0x1a   : > { %s2539_s9 = sshll.u32 %s133_s8, 7  ;;  %s2621_s10 = sshll.u32 %s3122_s24, 11 }
  0x1b   : > { %4601 = sst [smem:[#allocation16_spill]] %s3272_s7  ;;  %s137_s20 = scalar_lea.vmem [#allocation4], %s2539_s9 }
  0x1c   : > { %s4602_s1 = sld [smem:[#allocation18_spill]]  ;;  %s144_s28 = sshll.u32 %s137_s20, 4  ;;  %s145_s28 = int_to_ptr.vmem [resolvable:$true] %s144_s28 }
  0x1d   : > { %p3282_p9 = pnand %p4588_p8, %p51_p6  ;;  %p2545_p10 = scmp.ge.s32.totalorder %s3130_s26, 1 }
  0x1e   : > { %s134_s30 = scalar_lea.sflag [#allocation5], %s133_s8  ;;  %s2939_s7 = scalar_lea.vmem %s145_s28, 2048 }
  0x1f   : > { %p2928_p11 = pneg %p3282_p9  ;;  %p2940_p12 = scmp.ne.s32.totalorder %s145_s28, %s2939_s7 }
  0x20   : > { %s3132_s24 = smov [#allocation4]  }
  0x21   : > { %p2942_p13 = pnand %p2940_p12, %p2928_p11  ;;  %s2944_s11 = sshll.u32 %s3132_s24, 4  ;;  %s2945_s11 = int_to_ptr.vmem [resolvable:$false] %s2944_s11 }
  0x22   : > { %s143_s13 = scalar_lea.hbm %s4602_s1, %s2621_s10  ;;  %s2946_s9 = scalar_lea.vmem %s2945_s11, 4096 }
  0x23   : > { %p2943_p1 = pneg %p2942_p13  ;;  %p2947_p3 = scmp.lt.s32.totalorder %s145_s28, %s2945_s11 }
  0x24   : > { %p2948_p5 = scmp.lt.s32.totalorder %s2946_s9, %s2939_s7 }
  0x26   : > { %p2949_p2 = por %p2948_p5, %p2947_p3 }
  0x28   : > { %p2950_p6 = pnand %p2949_p2, %p2943_p1 }
  0x2a   : > { %2953 = shalt.err (!%p2950_p6)
}
  0x2b   : > { %s4587_s10 = smov 128   ;;  %s4589_s24 = smov 8  }
  0x2c   : > { %2729 = dma.hbm_to_vmem [thread:$0]  (!%p3282_p9), %s143_s13, 2048, %s145_s28, %s134_s30, %s4587_s10, %s4587_s10, %s4589_s24  }
  0x2d   : > { %s4604_s7 = sadd.s32 4294967295, %s3130_s26   ;;  %p173_p11 = scmp.lt.s32.totalorder %s3130_s26, 5 }
  0x2e   : > { %p3296_p2 = scmp.eq.s32.totalorder %s4604_s7, 3  ;;  %s35_s27 = sadd.s32 1, %s3126_s25 }
  0x2f   : > { %p3303_p12 = pnand %p2545_p10, %p173_p11  ;;  %s4651_s27 = smov (!%p3239_p0, %s35_s27), %s3126_s25 }
  0x30   : > { %s2536_s28 = sadd.s32 4294967294, %s3130_s26   ;;  %s68_s13 = sadd.s32 1, %s3098_s19 }
  0x31   : > { %p37_p9 = scmp.ge.s32.totalorder %s4651_s27, 2  ;;  %p81_p13 = scmp.ne.s32.totalorder %s3094_s18, %s3090_s17 }
  0x32   : > { %p75_p1 = scmp.ne.s32.totalorder %s3098_s19, %s3094_s18  ;;  %s96_s20 = sadd.s32 1, %s3086_s16 }
  0x33   : > { %s4653_s27 = smov (%p37_p9, %s4651_s27), 0  ;;  %p3322_p10 = por %p81_p13, %p3258_p4 }
  0x34   : > { %4607 = sst [smem:[#allocation17_spill]] %s4653_s27  ;;  %p106_p0 = scmp.ne.s32.totalorder %s3086_s16, %s3082_s15 }
  0x35   : > { %s65_s30 = ssub.s32 %s3126_s25, %s4653_s27  ;;  %p112_p3 = scmp.ne.s32.totalorder %s3082_s15, %s3078_s14 }
  0x36   : > { %p66_p5 = scmp.eq.s32.totalorder %s65_s30, 0  ;;  %s93_s17 = sor.u32 %s65_s30, %s3254_s4 }
  0x37   : > { %p94_p6 = scmp.eq.s32.totalorder %s93_s17, 0  ;;  %p3335_p11 = por %p3296_p2, %p106_p0 }
  0x38   : > { %s3340_s9 = scalar_select %p66_p5, %s3098_s19, %s68_s13  }
  0x39   : > { %s4609_s11 = scalar_select %p3335_p11, 1, 0 }
  0x3a   : > { %s3343_s5 = scalar_select %p94_p6, %s3086_s16, %s96_s20  }
  0x3b   : > { %p113_p4 = scmp.eq.s32.totalorder %s2536_s28, 3  ;;  %s154_s7 = sand.u32 1, %s3098_s19  }
  0x3c   : > { %p4610_p9 = scmp.eq.s32.totalorder %s3130_s26, 0  ;;  %s2542_s10 = sshll.u32 %s154_s7, 7 }
  0x3d   : > { %p3351_p8 = por %p113_p4, %p112_p3  ;;  %s2622_s4 = sshll.u32 %s3126_s25, 11 }
  0x3e   : > { %p77_p13 = por %p75_p1, %p4610_p9  ;;  %s158_s8 = scalar_lea.vmem [#allocation7], %s2542_s10 }
  0x3f   : > { %s4611_s24 = scalar_select %p3351_p8, 1, 0 }
  0x40   : > { %s165_s30 = sshll.u32 %s158_s8, 4  ;;  %s4612_s2 = sld [smem:[#allocation19_spill]]  ;;  %s166_s30 = int_to_ptr.vmem [resolvable:$true] %s165_s30 }
  0x41   : > { %p4613_p2 = scmp.lt.s32.totalorder %s3130_s26, 4  ;;  %s155_s20 = scalar_lea.sflag [#allocation8], %s154_s7 }
  0x42   : > { %s2967_s27 = scalar_lea.vmem %s166_s30, 2048  ;;  %s3135_s10 = smov [#allocation7]  }
  0x43   : > { %p3361_p0 = pnand %p4613_p2, %p77_p13  ;;  %p2968_p3 = scmp.ne.s32.totalorder %s166_s30, %s2967_s27 }
  0x44   : > { %s2972_s8 = sshll.u32 %s3135_s10, 4  ;;  %s2973_s8 = int_to_ptr.vmem [resolvable:$false] %s2972_s8 }
  0x45   : > { %p2956_p1 = pneg %p3361_p0  ;;  %s2974_s25 = scalar_lea.vmem %s2973_s8, 4096 }
  0x46   : > { %s164_s13 = scalar_lea.hbm %s4612_s2, %s2622_s4  ;;  %p2975_p4 = scmp.lt.s32.totalorder %s166_s30, %s2973_s8 }
  0x47   : > { %p2970_p5 = pnand %p2968_p3, %p2956_p1  ;;  %p2976_p9 = scmp.lt.s32.totalorder %s2974_s25, %s2967_s27 }
  0x49   : > { %p2971_p6 = pneg %p2970_p5  ;;  %p2977_p8 = por %p2976_p9, %p2975_p4 }
  0x4b   : > { %p2978_p11 = pnand %p2977_p8, %p2971_p6 }
  0x4d   : > { %2981 = shalt.err (!%p2978_p11)
}
  0x4e   : > { %s4615_s1 = smov 8   ;;  %s4616_s4 = smov 128  }
  0x4f   : > { %2732 = dma.hbm_to_vmem [thread:$0]  (!%p3361_p0), %s164_s13, 2048, %s166_s30, %s155_s20, %s4616_s4, %s4616_s4, %s4615_s1  }
  0x50   : > { %177 = sbr.rel (%p3303_p12) target bundleno = 480 (0x1e0), region = 28  ;;  %s179_s7 = sand.u32 (!%p3303_p12), 1, %s3106_s0  }
  0x51   : > { %s2546_s17 = sshll.u32 (!%p3303_p12), %s179_s7, 7  ;;  %s180_s10 = scalar_lea.sflag (!%p3303_p12), [#allocation5], %s179_s7 }
  0x52   : > { %s3375_s2 = scalar_lea.vmem (!%p3303_p12), [#allocation4], %s2546_s17 }
  0x55   : > { %3065 = dma.done.wait (%p3267_p7), %s180_s10, 2048  }
  0x56   : > { %3067 = vsyncadd (%p3267_p7), %s180_s10, 4294965248  ;;  %s188_s25 = sand.u32 1, %s3094_s18  }
  0x57   : > { %s2547_s27 = sshll.u32 %s188_s25, 7  ;;  %s189_s30 = scalar_lea.sflag [#allocation8], %s188_s25 }
  0x58   : > { %s3382_s13 = scalar_lea.vmem [#allocation7], %s2547_s27 }
  0x59   : > { %3069 = dma.done.wait (%p3322_p10), %s189_s30, 2048  }
  0x5a   : > { %3071 = vsyncadd (%p3322_p10), %s189_s30, 4294965248  ;;  %v271_v0 = vlaneseq  ;;  %s2549_s6 = sshll.u32 %s3114_s22, 7  ;;  %s270_s12 = sld [smem:[#allocation3]]  ;;  %v260_v8 = vld [vmem:[%s3382_s13 + $0x70] sm:$0xff]  ;;  %v261_v9 = vld [vmem:[%s3382_s13 + $0x78] sm:$0xff] }
  0x5b   : > { %s2550_s28 = sshll.u32 %s3118_s23, 7  ;;  %v3392_v3 = vstv %s2549_s6  ;;  %v258_v10 = vld [vmem:[%s3382_s13 + $0x60] sm:$0xff]  ;;  %v269_v11 = vpack.c.bf16 %v261_v9, %v260_v8  ;;  %v259_v12 = vld [vmem:[%s3382_s13 + $0x68] sm:$0xff]  ;;  %v256_v17 = vld [vmem:[%s3382_s13 + $0x50] sm:$0xff]  ;;  %s2623_s1 = sshll.u32 %s3114_s22, 5 }
  0x5c   : > { %v3389_v1 = vshrl.u32 %v271_v0, 7  ;;  %v281_v2 = vand.u32 127, %v271_v0  ;;  %v293_v4 = vstv %s2550_s28  ;;  %v268_v14 = vpack.c.bf16 %v259_v12, %v258_v10  ;;  %v222_v18 = vld [vmem:[%s3375_s2] sm:$0xff]  ;;  %v223_v19 = vld [vmem:[%s3375_s2 + $0x8] sm:$0xff]  ;;  %v257_v21 = vld [vmem:[%s3382_s13 + $0x58] sm:$0xff]  ;;  %s2423_s4 = sadd.s32 %s3118_s23, %s2623_s1  ;;  %p4630_p8 = scmp.ne.s32.totalorder %s4609_s11, 0 }
  0x5d   : > { %2640 = vmatprep.subr.bf16.mxu0 %v269_v11  ;;  %2672 = vmatprep.subr.bf16.mxu1 %v269_v11  ;;  %v238_v22 = vpack.c.bf16 %v223_v19, %v222_v18  ;;  %v230_v23 = vld [vmem:[%s3375_s2 + $0x40] sm:$0xff]  ;;  %v231_v24 = vld [vmem:[%s3375_s2 + $0x48] sm:$0xff]  ;;  %v267_v27 = vpack.c.bf16 %v257_v21, %v256_v17  ;;  %v252_v55 = vld [vmem:[%s3382_s13 + $0x30] sm:$0xff]  ;;  %s2618_s22 = sshll.u32 %s2423_s4, 7  ;;  %s3142_s30 = smov [#allocation9]  }
  0x5e   : > { %v274_v5 = vadd.s32 16, %v3389_v1  ;;  %v3396_v7 = vadd.s32 %v293_v4, %v281_v2  ;;  %2641 = vmatpush3.bf16.xpose.msra.mxu0 %v269_v11  ;;  %2680 = vmatpush3.bf16.xpose.msra.mxu1 %v269_v11  ;;  %v242_v25 = vpack.c.bf16 %v231_v24, %v230_v23  ;;  %v284_v31 = vadd.s32 %v3392_v3, %v3389_v1  ;;  %v254_v36 = vld [vmem:[%s3382_s13 + $0x40] sm:$0xff]  ;;  %v255_v37 = vld [vmem:[%s3382_s13 + $0x48] sm:$0xff]  ;;  %v253_v56 = vld [vmem:[%s3382_s13 + $0x38] sm:$0xff]  ;;  %s4496_s10 = scalar_lea.hbm %s4582_s3, %s2618_s22 }
  0x5f   : > { %2642 = vmatprep.subr.bf16.mxu0 %v268_v14  ;;  %2673 = vmatprep.subr.bf16.mxu1 %v268_v14  ;;  %v275_v32 = vadd.s32 24, %v3389_v1  ;;  %v273_v35 = vadd.s32 8, %v3389_v1  ;;  %v266_v44 = vpack.c.bf16 %v255_v37, %v254_v36  ;;  %v265_v63 = vpack.c.bf16 %v253_v56, %v252_v55  ;;  %v251_v17 = vld [vmem:[%s3382_s13 + $0x28] sm:$0xff]  ;;  %v248_v37 = vld [vmem:[%s3382_s13 + $0x10] sm:$0xff] }
  0x60   : > { %v286_v6 = vadd.s32 %v3392_v3, %v274_v5  ;;  %s319_s29 = smul.u32 2654435769, %s270_s12  ;;  %2656 = vmatprep.mubr.bf16.mxu0 %v238_v22  ;;  %2664 = vmatprep.mubr.bf16.mxu1 %v242_v25  ;;  %v295_v34 = vmul.u32 256, %v284_v31  ;;  %v278_v4 = vadd.s32 48, %v3389_v1  ;;  %v276_v36 = vadd.s32 32, %v3389_v1 }
  0x61   : > { %v287_v39 = vadd.s32 %v3392_v3, %v275_v32  ;;  %v285_v42 = vadd.s32 %v3392_v3, %v273_v35 }
  0x62   : > { %v297_v13 = vmul.u32 256, %v286_v6  ;;  %v3403_v16 = vstv %s319_s29  ;;  %v303_v41 = vadd.s32 %v295_v34, %v3396_v7 }
  0x63   : > { %v298_v43 = vmul.u32 256, %v287_v39  ;;  %v296_v49 = vmul.u32 256, %v285_v42 }
  0x64   : > { %v305_v15 = vadd.s32 %v297_v13, %v3396_v7  ;;  %v311_v46 = vmul.u32 2, %v303_v41 }
  0x65   : > { %v306_v48 = vadd.s32 %v298_v43, %v3396_v7  ;;  %v304_v59 = vadd.s32 %v296_v49, %v3396_v7  ;;  %v3450_v49 = vadd.s32 %v3392_v3, %v276_v36 }
  0x66   : > { %v313_v20 = vmul.u32 2, %v305_v15  ;;  %2643 = vmatpush3.bf16.xpose.msra.mxu0 %v268_v14  ;;  %2681 = vmatpush3.bf16.xpose.msra.mxu1 %v268_v14  ;;  %v3423_v51 = vadd.s32 %v3403_v16, %v311_v46  ;;  %v290_v14 = vadd.s32 %v3392_v3, %v278_v4  ;;  %v250_v15 = vld [vmem:[%s3382_s13 + $0x20] sm:$0xff] }
  0x67   : > { %2644 = vmatprep.subr.bf16.mxu0 %v267_v27  ;;  %2674 = vmatprep.subr.bf16.mxu1 %v267_v27  ;;  %v314_v52 = vmul.u32 2, %v306_v48  ;;  %v312_v8 = vmul.u32 2, %v304_v59  ;;  %v264_v24 = vpack.c.bf16 %v251_v17, %v250_v15  ;;  %v3138_v15 = vmov 2131351028  }
  0x68   : > { %v323_v26 = vadd.s32 %v3403_v16, %v313_v20  ;;  %v393_v54 = vadd.s32 1, %v3423_v51 }
  0x69   : > { %v3429_v58 = vadd.s32 %v3403_v16, %v314_v52  ;;  %v3438_v20 = vadd.s32 %v3403_v16, %v312_v8  ;;  %v247_v52 = vld [vmem:[%s3382_s13 + $0x8] sm:$0xff] }
  0x6a   : > { %v395_v28 = vadd.s32 1, %v323_v26  ;;  %v331_v29 = vshrl.u32 %v323_v26, 16  ;;  %v401_v61 = vshrl.u32 %v393_v54, 16 }
  0x6b   : > { %v396_v62 = vadd.s32 1, %v3429_v58 }
  0x6c   : > { %v403_v30 = vshrl.u32 %v395_v28, 16  ;;  %v339_v38 = vxor.u32 %v331_v29, %v323_v26  ;;  %v409_v2 = vxor.u32 %v401_v61, %v393_v54 }
  0x6d   : > { %v404_v6 = vshrl.u32 %v396_v62, 16 }
  0x6e   : > { %v411_v33 = vxor.u32 %v403_v30, %v395_v28  ;;  %v347_v47 = vmul.u32 2146121005, %v339_v38  ;;  %2645 = vmatpush3.bf16.xpose.msra.mxu0 %v267_v27  ;;  %2682 = vmatpush3.bf16.xpose.msra.mxu1 %v267_v27  ;;  %v417_v10 = vmul.u32 2146121005, %v409_v2  ;;  %v394_v30 = vadd.s32 1, %v3438_v20  ;;  %v249_v38 = vld [vmem:[%s3382_s13 + $0x18] sm:$0xff] }
  0x6f   : > { %2646 = vmatprep.subr.bf16.mxu0 %v266_v44  ;;  %2675 = vmatprep.subr.bf16.mxu1 %v266_v44  ;;  %v412_v11 = vxor.u32 %v404_v6, %v396_v62  ;;  %v301_v27 = vmul.u32 256, %v290_v14 }
  0x70   : > { %v419_v40 = vmul.u32 2146121005, %v411_v33  ;;  %v355_v57 = vshrl.u32 %v347_v47, 15  ;;  %v425_v13 = vshrl.u32 %v417_v10, 15  ;;  %v402_v42 = vshrl.u32 %v394_v30, 16 }
  0x71   : > { %v420_v19 = vmul.u32 2146121005, %v412_v11  ;;  %v309_v35 = vadd.s32 %v301_v27, %v3396_v7  ;;  %v3136_v11 = vmov 683565275  }
  0x72   : > { %v427_v45 = vshrl.u32 %v419_v40, 15  ;;  %v363_v5 = vxor.u32 %v355_v57, %v347_v47  ;;  %v433_v22 = vxor.u32 %v425_v13, %v417_v10  ;;  %v263_v47 = vpack.c.bf16 %v249_v38, %v248_v37 }
  0x73   : > { %v428_v23 = vshrl.u32 %v420_v19, 15  ;;  %v3454_v55 = vxor.u32 %v402_v42, %v394_v30  ;;  %v317_v56 = vmul.u32 2, %v309_v35  ;;  %v3137_v13 = vmov 2475754826  }
  0x74   : > { %v435_v50 = vxor.u32 %v427_v45, %v419_v40  ;;  %v371_v18 = vmul.u32 2221713035, %v363_v5  ;;  %v441_v26 = vmul.u32 2221713035, %v433_v22  ;;  %v3139_v22 = vmov 2102212464  }
  0x75   : > { %v436_v29 = vxor.u32 %v428_v23, %v420_v19  ;;  %v418_v2 = vmul.u32 2146121005, %v3454_v55  ;;  %v3464_v4 = vadd.s32 %v3403_v16, %v317_v56  ;;  %v299_v5 = vmul.u32 256, %v3450_v49  ;;  %v224_v56 = vld [vmem:[%s3375_s2 + $0x10] sm:$0xff] }
  0x76   : > { %v443_v53 = vmul.u32 2221713035, %v435_v50  ;;  %2647 = vmatpush3.bf16.xpose.msra.mxu0 %v266_v44  ;;  %2683 = vmatpush3.bf16.xpose.msra.mxu1 %v266_v44  ;;  %v379_v28 = vshrl.u32 %v371_v18, 16  ;;  %v449_v32 = vshrl.u32 %v441_v26, 16  ;;  %v246_v50 = vld [vmem:[%s3382_s13] sm:$0xff]  ;;  %s2986_s13 = sshll.u32 %s3142_s30, 4  ;;  %s2987_s13 = int_to_ptr.vmem [resolvable:$false] %s2986_s13 }
  0x77   : > { %2648 = vmatprep.subr.bf16.mxu0 %v265_v63  ;;  %2676 = vmatprep.subr.bf16.mxu1 %v265_v63  ;;  %v444_v33 = vmul.u32 2221713035, %v436_v29  ;;  %v3458_v62 = vpack.c.bf16 %v247_v52, %v246_v50  ;;  %v3141_v30 = vmov 1326507024   ;;  %s2988_s6 = scalar_lea.vmem %s2987_s13, 4096 }
  0x78   : > { %v451_v60 = vshrl.u32 %v443_v53, 16  ;;  %v387_v39 = vxor.u32 %v379_v28, %v371_v18  ;;  %v457_v40 = vxor.u32 %v449_v32, %v441_v26 }
  0x79   : > { %v452_v41 = vshrl.u32 %v444_v33, 16 }
  0x7a   : > { %v459_v0 = vxor.u32 %v451_v60, %v443_v53  ;;  %v497_v45 = vshrl.u32 %v457_v40, 8  ;;  %v467_v53 = vshrl.u32 %v387_v39, 8 }
  0x7b   : > { %v460_v46 = vxor.u32 %v452_v41, %v444_v33 }
  0x7c   : > { %v499_v9 = vshrl.u32 %v459_v0, 8  ;;  %v505_v54 = vcvt.s32.f32 %v497_v45  ;;  %v3460_v0 = vcvt.s32.f32 %v467_v53 }
  0x7d   : > { %v500_v59 = vshrl.u32 %v460_v46, 8 }
  0x7e   : > { %v507_v12 = vcvt.s32.f32 %v499_v9  ;;  %2649 = vmatpush3.bf16.xpose.msra.mxu0 %v265_v63  ;;  %2684 = vmatpush3.bf16.xpose.msra.mxu1 %v265_v63  ;;  %v513_v61 = vmul.f32 5.9604645e-08, %v505_v54  ;;  %v426_v54 = vshrl.u32 %v418_v2, 15 }
  0x7f   : > { %2650 = vmatprep.subr.bf16.mxu0 %v264_v24  ;;  %2677 = vmatprep.subr.bf16.mxu1 %v264_v24  ;;  %v508_v10 = vcvt.s32.f32 %v500_v59 }
  0x80   : > { %v515_v21 = vmul.f32 5.9604645e-08, %v507_v12  ;;  %v3470_v18 = vmul.f32 6.2831855, %v513_v61 }
  0x81   : > { %v516_v33 = vmul.f32 5.9604645e-08, %v508_v10 }
  0x82   : > { %v3440_v25 = vmul.f32 6.2831855, %v515_v21  ;;  %v612_v39 = vand.u32 2139095040, %v3470_v18 }
  0x84   : > { %v818_v31 = vand.u32 2139095040, %v3440_v25  ;;  %v815_v43 = vand.u32 2147483647, %v3440_v25  ;;  %vm817_vm14 = vcmp.lt.s32.totalorder %v3440_v25, 0 }
  0x86   : > { %v819_v34 = vshrl.u32 %v818_v31, 23  ;;  %v822_v57 = vand.u32 8388607, %v815_v43  ;;  %2651 = vmatpush3.bf16.xpose.msra.mxu0 %v264_v24  ;;  %2685 = vmatpush3.bf16.xpose.msra.mxu1 %v264_v24  ;;  %v3140_v24 = vmov 920167782  }
  0x87   : > { %2652 = vmatprep.subr.bf16.mxu0 %v263_v47  ;;  %2678 = vmatprep.subr.bf16.mxu1 %v263_v47 }
  0x88   : > { %v2559_v44 = vadd.s32 4294967169, %v819_v34  ;;  %v823_v6 = vor.u32 8388608, %v822_v57  ;;  %v225_v57 = vld [vmem:[%s3375_s2 + $0x18] sm:$0xff] }
  0x8a   : > { %v825_v48 = vadd.s32 1, %v2559_v44  ;;  %v3480_v32 = vshll.u32 %v823_v6, 8  ;;  %v232_v6 = vld [vmem:[%s3375_s2 + $0x50] sm:$0xff] }
  0x8c   : > { %vm826_vm0 = vcmp.gt.s32.totalorder %v825_v48, 0 }
  0x8d   : > { %v827_v60 = vsel %vm826_vm0, %v825_v48, 0  ;;  %v613_v48 = vshrl.u32 %v612_v39, 23 }
  0x8e   : > { %v829_v63 = vand.u32 31, %v827_v60  ;;  %v828_v8 = vshrl.u32 %v827_v60, 5  ;;  %2653 = vmatpush3.bf16.xpose.msra.mxu0 %v263_v47  ;;  %2686 = vmatpush3.bf16.xpose.msra.mxu1 %v263_v47 }
  0x8f   : > { %2654 = vmatprep.subr.bf16.mxu0 %v3458_v62  ;;  %2679 = vmatprep.subr.bf16.mxu1 %v3458_v62  ;;  %v2551_v61 = vadd.s32 4294967169, %v613_v48  ;;  %v609_v48 = vand.u32 2147483647, %v3470_v18 }
  0x90   : > { %v830_v9 = vsub.s32 32, %v829_v63  ;;  %v832_v12 = vshll.u32 %v3136_v11, %v829_v63  ;;  %v835_v14 = vshll.u32 %v3137_v13, %v829_v63  ;;  %v838_v17 = vshll.u32 %v3138_v15, %v829_v63 }
  0x91   : > { %v841_v23 = vshll.u32 %v3139_v22, %v829_v63  ;;  %v844_v26 = vshll.u32 %v3140_v24, %v829_v63  ;;  %vm847_vm1 = vcmp.lt.s32.totalorder %v828_v8, 1  ;;  %vm848_vm2 = vcmp.lt.s32.totalorder %v828_v8, 2 }
  0x92   : > { %v833_v19 = vshrl.u32 %v3137_v13, %v830_v9  ;;  %v836_v21 = vshrl.u32 %v3138_v15, %v830_v9  ;;  %v831_v27 = vshrl.u32 %v3136_v11, %v830_v9  ;;  %v839_v28 = vshrl.u32 %v3139_v22, %v830_v9 }
  0x93   : > { %v842_v29 = vshrl.u32 %v3140_v24, %v830_v9  ;;  %v845_v31 = vshrl.u32 %v3141_v30, %v830_v9  ;;  %vm849_vm3 = vcmp.lt.s32.totalorder %v828_v8, 3  ;;  %vm850_vm4 = vcmp.lt.s32.totalorder %v828_v8, 4  ;;  %v226_v8 = vld [vmem:[%s3375_s2 + $0x20] sm:$0xff] }
  0x94   : > { %v834_v34 = vor.u32 %v833_v19, %v832_v12  ;;  %v837_v35 = vor.u32 %v836_v21, %v835_v14  ;;  %v840_v36 = vor.u32 %v839_v28, %v838_v17  ;;  %v3498_v63 = vmul.f32 6.2831855, %v516_v33  ;;  %v233_v17 = vld [vmem:[%s3375_s2 + $0x58] sm:$0xff]  ;;  %v227_v19 = vld [vmem:[%s3375_s2 + $0x28] sm:$0xff]  ;;  %v3518_v28 = vld [vmem:[%s3375_s2 + $0x30] sm:$0xff] }
  0x95   : > { %v843_v37 = vor.u32 %v842_v29, %v841_v23  ;;  %v846_v38 = vor.u32 %v845_v31, %v844_v26  ;;  %v619_v21 = vadd.s32 1, %v2551_v61  ;;  %v239_v23 = vpack.c.bf16 %v225_v57, %v224_v56  ;;  %v234_v26 = vld [vmem:[%s3375_s2 + $0x60] sm:$0xff]  ;;  %v3526_v31 = vld [vmem:[%s3375_s2 + $0x38] sm:$0xff]  ;;  %v3529_v33 = vld [vmem:[%s3375_s2 + $0x70] sm:$0xff] }
  0x96   : > { %v851_v40 = vsel %vm847_vm1, %v831_v27, %v834_v34  ;;  %v852_v41 = vsel %vm850_vm4, %v840_v36, 2102212464  ;;  %v855_v42 = vsel %vm847_vm1, %v834_v34, %v837_v35  ;;  %v859_v44 = vsel %vm847_vm1, %v837_v35, %v840_v36  ;;  %2655 = vmatpush3.bf16.xpose.msra.mxu0 %v3458_v62  ;;  %2687 = vmatpush3.bf16.xpose.msra.mxu1 %v3458_v62  ;;  %v235_v27 = vld [vmem:[%s3375_s2 + $0x68] sm:$0xff]  ;;  %v237_v34 = vld [vmem:[%s3375_s2 + $0x78] sm:$0xff]  ;;  %s215_s2 = sand.u32 1, %s3082_s15  }
  0x97   : > { %v853_v45 = vsel %vm849_vm3, %v837_v35, %v852_v41  ;;  %v856_v46 = vsel %vm850_vm4, %v843_v37, 920167782  ;;  %v860_v47 = vsel %vm850_vm4, %v846_v38, 1326507024  ;;  %v3523_v29 = vadd.s32 %v299_v5, %v3396_v7  ;;  %s2548_s20 = sshll.u32 %s215_s2, 7  ;;  %s4504_s25 = scalar_lea.sflag [#allocation6], %s215_s2 }
  0x98   : > { %v854_v50 = vsel %vm848_vm2, %v851_v40, %v853_v45  ;;  %v857_v52 = vsel %vm849_vm3, %v840_v36, %v856_v46  ;;  %v861_v53 = vsel %vm849_vm3, %v843_v37, %v860_v47  ;;  %vm620_vm5 = vcmp.gt.s32.totalorder %v619_v21, 0  ;;  %s4320_s8 = scalar_lea.vmem [#allocation9], %s2548_s20 }
  0x99   : > { %v858_v59 = vsel %vm848_vm2, %v855_v42, %v857_v52  ;;  %v862_v60 = vsel %vm848_vm2, %v859_v44, %v861_v53  ;;  %v870_v35 = vmul.u32 %v3480_v32, %v854_v50  ;;  %v3535_v62 = vxor.u32 %v426_v54, %v418_v2  ;;  %s2426_s7 = sshll.u32 %s4320_s8, 4  ;;  %s4498_s7 = int_to_ptr.vmem [resolvable:$true] %s2426_s7 }
  0x9a   : > { %v3502_v9 = vmul.u32.u64.low %v3480_v32, %v862_v60  ;;  %v3503_v10 = vmul.u32.u64.high %v3480_v32, %v862_v60, %v3502_v9  ;;  %v3506_v12 = vmul.u32.u64.low %v3480_v32, %v858_v59  ;;  %v3507_v14 = vmul.u32.u64.high %v3480_v32, %v858_v59, %v3506_v12  ;;  %s2982_s27 = scalar_lea.vmem %s4498_s7, 2048  ;;  %p2989_p11 = scmp.lt.s32.totalorder %s4498_s7, %s2987_s13 }
  0x9b   : > { %v3538_v36 = vadd.s32 1, %v3464_v4  ;;  %v483_v37 = vmul.f32 5.9604645e-08, %v3460_v0  ;;  %v921_v5 = vand.u32 2139095040, %v3498_v63  ;;  %v243_v38 = vpack.c.bf16 %v233_v17, %v232_v6  ;;  %p2983_p7 = scmp.ne.s32.totalorder %s4498_s7, %s2982_s27  ;;  %p2990_p13 = scmp.lt.s32.totalorder %s2988_s6, %s2982_s27 }
  0x9c   : > { %vm872_vm6 = vc.u32 %v3503_v10, %v3506_v12  ;;  %v873_v49 = vadd.s32 1, %v3507_v14  ;;  %v240_v39 = vpack.c.bf16 %v227_v19, %v226_v8  ;;  %v244_v32 = vpack.c.bf16 %v235_v27, %v234_v26 }
  0x9d   : > { %v621_v40 = vsel %vm620_vm5, %v619_v21, 0  ;;  %v241_v55 = vpack.c.bf16 %v3526_v31, %v3518_v28  ;;  %v245_v2 = vpack.c.bf16 %v237_v34, %v3529_v33  ;;  %v442_v44 = vmul.u32 2221713035, %v3535_v62  ;;  %2657 = vmatmul.mubr.bf16.vlgmr.msra.gmra.mxu0 %v239_v23  ;;  %2665 = vmatmul.mubr.bf16.vlgmr.msra.gmra.mxu1 %v243_v38  ;;  %p2984_p12 = pnand %p2983_p7, %p4630_p8  ;;  %p2991_p2 = por %p2990_p13, %p2989_p11 }
  0x9e   : > { %v874_v41 = vsel %vm872_vm6, %v873_v49, %v3507_v14  ;;  %v623_v42 = vand.u32 31, %v621_v40  ;;  %v407_v45 = vshrl.u32 %v3538_v36, 16  ;;  %v315_v46 = vmul.u32 2, %v3523_v29  ;;  %2660 = vmatprep.mubr.bf16.mxu0 %v240_v39  ;;  %2668 = vmatprep.mubr.bf16.mxu1 %v244_v32 }
  0x9f   : > { %v875_v0 = vadd.s32 %v874_v41, %v870_v35  ;;  %v491_v47 = vsub.f32 1.0, %v483_v37  ;;  %v922_v52 = vshrl.u32 %v921_v5, 23  ;;  %v622_v59 = vshrl.u32 %v621_v40, 5  ;;  %p2985_p10 = pneg %p2984_p12 }
  0xa0   : > { %v624_v50 = vsub.s32 32, %v623_v42  ;;  %v626_v54 = vshll.u32 %v3136_v11, %v623_v42  ;;  %v629_v56 = vshll.u32 %v3137_v13, %v623_v42  ;;  %v635_v57 = vshll.u32 %v3139_v22, %v623_v42 }
  0xa1   : > { %v876_v53 = vadd.s32 536870912, %v875_v0  ;;  %v632_v6 = vshll.u32 %v3138_v15, %v623_v42  ;;  %v450_v8 = vshrl.u32 %v442_v44, 16  ;;  %v329_v19 = vshrl.u32 %v3423_v51, 16  ;;  %p2992_p0 = pnand %p2991_p2, %p2985_p10 }
  0xa2   : > { %v627_v60 = vshrl.u32 %v3137_v13, %v624_v50  ;;  %v630_v61 = vshrl.u32 %v3138_v15, %v624_v50  ;;  %v633_v14 = vshrl.u32 %v3139_v22, %v624_v50  ;;  %v636_v17 = vshrl.u32 %v3140_v24, %v624_v50 }
  0xa3   : > { %v3559_v9 = vshrl.u32 %v876_v53, 30  ;;  %v616_v21 = vand.u32 8388607, %v609_v48  ;;  %v638_v23 = vshll.u32 %v3140_v24, %v623_v42  ;;  %v639_v26 = vshrl.u32 %v3141_v30, %v624_v50 }
  0xa4   : > { %v628_v28 = vor.u32 %v627_v60, %v626_v54  ;;  %v631_v31 = vor.u32 %v630_v61, %v629_v56  ;;  %v637_v33 = vor.u32 %v636_v17, %v635_v57  ;;  %v337_v34 = vxor.u32 %v329_v19, %v3423_v51 }
  0xa5   : > { %v878_v27 = vshll.u32 %v3559_v9, 30  ;;  %v634_v35 = vor.u32 %v633_v14, %v632_v6  ;;  %vm641_vm7 = vcmp.lt.s32.totalorder %v622_v59, 1  ;;  %v2563_v37 = vadd.s32 4294967169, %v922_v52  ;;  %2661 = vmatmul.mubr.bf16.gmra.mxu0 %v241_v55  ;;  %2669 = vmatmul.mubr.bf16.gmra.mxu1 %v245_v2 }
  0xa6   : > { %v625_v5 = vshrl.u32 %v3136_v11, %v624_v50  ;;  %vm643_vm8 = vcmp.lt.s32.totalorder %v622_v59, 3  ;;  %vm644_vm9 = vcmp.lt.s32.totalorder %v622_v59, 4  ;;  %v345_v38 = vmul.u32 2146121005, %v337_v34 }
  0xa7   : > { %v3572_v49 = vsub.s32 %v875_v0, %v878_v27  ;;  %v617_v39 = vor.u32 8388608, %v616_v21  ;;  %v640_v32 = vor.u32 %v639_v26, %v638_v23  ;;  %v646_v40 = vsel %vm644_vm9, %v634_v35, 2102212464 }
  0xa8   : > { %vm642_vm10 = vcmp.lt.s32.totalorder %v622_v59, 2  ;;  %v649_v51 = vsel %vm641_vm7, %v628_v28, %v631_v31  ;;  %v650_v42 = vsel %vm644_vm9, %v637_v33, 920167782  ;;  %2862 = vlog2.f32 %v491_v47 }
  0xa9   : > { %v881_v41 = vsub.s32 0, %v3572_v49  ;;  %v353_v0 = vshrl.u32 %v345_v38, 15  ;;  %v651_v50 = vsel %vm643_vm8, %v634_v35, %v650_v42  ;;  %v928_v52 = vadd.s32 1, %v2563_v37 }
  0xaa   : > { %v645_v54 = vsel %vm641_vm7, %v625_v5, %v628_v28  ;;  %v647_v56 = vsel %vm643_vm8, %v631_v31, %v646_v40  ;;  %v653_v55 = vsel %vm641_vm7, %v631_v31, %v634_v35  ;;  %v652_v57 = vsel %vm642_vm10, %v649_v51, %v651_v50 }
  0xab   : > { %v2560_v53 = vmin.u32 %v881_v41, %v3572_v49  ;;  %v361_v2 = vxor.u32 %v353_v0, %v345_v38  ;;  %v654_v60 = vsel %vm644_vm9, %v640_v32, 1326507024  ;;  %v657_v61 = vshll.u32 %v617_v39, 8 }
  0xac   : > { %v655_v47 = vsel %vm643_vm8, %v637_v33, %v654_v60  ;;  %v332_v14 = vshrl.u32 %v3429_v58, 16  ;;  %v458_v17 = vxor.u32 %v450_v8, %v442_v44  ;;  %v648_v19 = vsel %vm642_vm10, %v645_v54, %v647_v56 }
  0xad   : > { %v883_v6 = vclz %v2560_v53  ;;  %v656_v21 = vsel %vm642_vm10, %v653_v55, %v655_v47  ;;  %v3592_v23 = vmul.u32.u64.low %v657_v61, %v652_v57  ;;  %v3593_v26 = vmul.u32.u64.high %v657_v61, %v652_v57, %v3592_v23 }
  0xae   : > { %v3596_v28 = vmul.u32.u64.low %v657_v61, %v656_v21  ;;  %v3597_v31 = vmul.u32.u64.high %v657_v61, %v656_v21, %v3596_v28  ;;  %v3602_v33 = vadd.s32 %v3403_v16, %v315_v46  ;;  %v369_v34 = vmul.u32 2221713035, %v361_v2 }
  0xaf   : > { %v2561_v27 = vadd.s32 4294967294, %v883_v6  ;;  %v340_v62 = vxor.u32 %v332_v14, %v3429_v58  ;;  %vm929_vm11 = vcmp.gt.s32.totalorder %v928_v52, 0  ;;  %v3608_v44 = vxor.u32 %v407_v45, %v3538_v36 }
  0xb0   : > { %v871_v59 = vadd.s32 %v3506_v12, %v3503_v10  ;;  %v664_v8 = vmul.u32 %v657_v61, %v648_v19  ;;  %v498_v35 = vshrl.u32 %v458_v17, 8  ;;  %v667_v29 = vadd.s32 1, %v3593_v26 }
  0xb1   : > { %vm2562_vm12 = vcmp.lt.s32.totalorder %v2561_v27, 0  ;;  %v348_v46 = vmul.u32 2146121005, %v340_v62  ;;  %v930_v5 = vsel %vm929_vm11, %v928_v52, 0  ;;  %vm666_vm13 = vc.u32 %v3597_v31, %v3592_v23 }
  0xb2   : > { %v886_v37 = vsel %vm2562_vm12, 0, %v2561_v27  ;;  %v918_v58 = vand.u32 2147483647, %v3498_v63  ;;  %v377_v45 = vshrl.u32 %v369_v34, 16  ;;  %v668_v10 = vsel %vm666_vm13, %v667_v29, %v3593_v26 }
  0xb3   : > { %v887_v38 = vsub.s32 32, %v886_v37  ;;  %v891_v39 = vsub.s32 4294967266, %v886_v37  ;;  %v888_v36 = vshll.u32 %v3572_v49, %v886_v37  ;;  %v356_v12 = vshrl.u32 %v348_v46, 15 }
  0xb4   : > { %v669_v41 = vadd.s32 %v668_v10, %v664_v8  ;;  %v932_v51 = vand.u32 31, %v930_v5  ;;  %v3619_v42 = vadd.s32 1, %v3602_v33  ;;  %v925_v49 = vand.u32 8388607, %v918_v58 }
  0xb5   : > { %v889_v32 = vshrl.u32 %v871_v59, %v887_v38  ;;  %v892_v40 = vadd.s32 127, %v891_v39  ;;  %v2863_v0 = vpop.eup %2862  ;;  %v364_v53 = vxor.u32 %v356_v12, %v348_v46  ;;  %v506_v55 = vcvt.s32.f32 %v498_v35 }
  0xb6   : > { %v670_v52 = vadd.s32 536870912, %v669_v41  ;;  %v933_v54 = vsub.s32 32, %v932_v51  ;;  %v423_v2 = vmul.u32 2146121005, %v3608_v44  ;;  %v385_v60 = vxor.u32 %v377_v45, %v369_v34 }
  0xb7   : > { %v893_v50 = vshll.u32 %v892_v40, 23  ;;  %v890_v56 = vor.u32 %v889_v32, %v888_v36  ;;  %v935_v6 = vshll.u32 %v3136_v11, %v932_v51  ;;  %v931_v47 = vshrl.u32 %v930_v5, 5 }
  0xb8   : > { %v3624_v61 = vshrl.u32 %v670_v52, 30  ;;  %v936_v14 = vshrl.u32 %v3137_v13, %v933_v54  ;;  %v938_v17 = vshll.u32 %v3137_v13, %v932_v51  ;;  %v939_v19 = vshrl.u32 %v3138_v15, %v933_v54 }
  0xb9   : > { %v894_v57 = vor.u32 4788187, %v893_v50  ;;  %v372_v26 = vmul.u32 2221713035, %v364_v53  ;;  %v941_v27 = vshll.u32 %v3138_v15, %v932_v51  ;;  %v942_v28 = vshrl.u32 %v3139_v22, %v933_v54 }
  0xba   : > { %v672_v21 = vshll.u32 %v3624_v61, 30  ;;  %v526_v62 = vmul.f32 0.6931472, %v2863_v0  ;;  %v897_v59 = vcvt.s32.f32 %v890_v56  ;;  %v926_v8 = vor.u32 8388608, %v925_v49 }
  0xbb   : > { %v895_v34 = vand.u32 2147483647, %v894_v57  ;;  %v465_v35 = vshrl.u32 %v385_v60, 8  ;;  %v937_v29 = vor.u32 %v936_v14, %v935_v6  ;;  %v944_v46 = vshll.u32 %v3139_v22, %v932_v51 }
  0xbc   : > { %v3633_v37 = vsub.s32 %v669_v41, %v672_v21  ;;  %v940_v5 = vor.u32 %v939_v19, %v938_v17  ;;  %v945_v38 = vshrl.u32 %v3140_v24, %v933_v54  ;;  %v947_v39 = vshll.u32 %v3140_v24, %v932_v51 }
  0xbd   : > { %v948_v36 = vshrl.u32 %v3141_v30, %v933_v54  ;;  %v380_v10 = vshrl.u32 %v372_v26, 16  ;;  %v943_v12 = vor.u32 %v942_v28, %v941_v27  ;;  %vm950_vm15 = vcmp.lt.s32.totalorder %v931_v47, 1 }
  0xbe   : > { %v675_v45 = vsub.s32 0, %v3633_v37  ;;  %v898_v32 = vmul.f32 %v897_v59, %v895_v34  ;;  %v934_v40 = vshrl.u32 %v3136_v11, %v933_v54  ;;  %v946_v41 = vor.u32 %v945_v38, %v944_v46 }
  0xbf   : > { %vm953_vm0 = vcmp.lt.s32.totalorder %v931_v47, 4  ;;  %v949_v50 = vor.u32 %v948_v36, %v947_v39  ;;  %vm952_vm1 = vcmp.lt.s32.totalorder %v931_v47, 3  ;;  %v473_v53 = vcvt.s32.f32 %v465_v35 }
  0xc0   : > { %v2552_v0 = vmin.u32 %v675_v45, %v3633_v37  ;;  %v955_v52 = vsel %vm953_vm0, %v943_v12, 2102212464  ;;  %vm951_vm2 = vcmp.lt.s32.totalorder %v931_v47, 2  ;;  %v958_v51 = vsel %vm950_vm15, %v937_v29, %v940_v5 }
  0xc1   : > { %v966_v56 = vshll.u32 %v926_v8, 8  ;;  %v388_v57 = vxor.u32 %v380_v10, %v372_v26  ;;  %v959_v60 = vsel %vm953_vm0, %v946_v41, 920167782  ;;  %v514_v6 = vmul.f32 5.9604645e-08, %v506_v55 }
  0xc2   : > { %v677_v49 = vclz %v2552_v0  ;;  %v954_v54 = vsel %vm950_vm15, %v934_v40, %v937_v29  ;;  %v956_v14 = vsel %vm952_vm1, %v940_v5, %v955_v52  ;;  %v960_v17 = vsel %vm952_vm1, %v943_v12, %v959_v60 }
  0xc3   : > { %v962_v19 = vsel %vm950_vm15, %v940_v5, %v943_v12  ;;  %v899_v21 = vxor.u32 2147483648, %v898_v32  ;;  %v961_v28 = vsel %vm951_vm2, %v958_v51, %v960_v17  ;;  %v963_v34 = vsel %vm953_vm0, %v949_v50, 1326507024 }
  0xc4   : > { %v2553_v27 = vadd.s32 4294967294, %v677_v49  ;;  %v481_v59 = vmul.f32 5.9604645e-08, %v473_v53  ;;  %v964_v26 = vsel %vm952_vm1, %v946_v41, %v963_v34  ;;  %v957_v55 = vsel %vm951_vm2, %v954_v54, %v956_v14 }
  0xc5   : > { %v3653_v8 = vmul.u32.u64.low %v966_v56, %v961_v28  ;;  %v3654_v35 = vmul.u32.u64.high %v966_v56, %v961_v28, %v3653_v8  ;;  %v965_v29 = vsel %vm951_vm2, %v962_v19, %v964_v26  ;;  %v405_v46 = vshrl.u32 %v3619_v42, 16 }
  0xc6   : > { %vm2554_vm3 = vcmp.lt.s32.totalorder %v2553_v27, 0  ;;  %vm3662_vm4 = vcmp.le.f32.partialorder %v815_v43, 0.7853982  ;;  %v3666_v39 = vmul.u32.u64.low %v966_v56, %v965_v29  ;;  %v3667_v36 = vmul.u32.u64.high %v966_v56, %v965_v29, %v3666_v39 }
  0xc7   : > { %v680_v38 = vsel %vm2554_vm3, 0, %v2553_v27  ;;  %v3669_v45 = vmul.f32 -2.0, %v526_v62  ;;  %v900_v10 = vsel %vm817_vm14, %v899_v21, %v898_v32  ;;  %v468_v12 = vshrl.u32 %v388_v57, 8 }
  0xc8   : > { %v3673_v47 = vmul.f32 6.2831855, %v514_v6  ;;  %v489_v40 = vsub.f32 1.0, %v481_v59  ;;  %v973_v41 = vmul.u32 %v966_v56, %v957_v55  ;;  %v976_v0 = vadd.s32 1, %v3654_v35 }
  0xc9   : > { %v431_v43 = vshrl.u32 %v423_v2, 15  ;;  %v685_v50 = vsub.s32 4294967266, %v680_v38  ;;  %v903_v52 = vsel %vm3662_vm4, %v3440_v25, %v900_v10  ;;  %vm975_vm5 = vc.u32 %v3667_v36, %v3653_v8 }
  0xca   : > { %v413_v62 = vxor.u32 %v405_v46, %v3619_v42  ;;  %2864 = vrsqrt.f32 %v3669_v45  ;;  %v476_v32 = vcvt.s32.f32 %v468_v12  ;;  %v977_v53 = vsel %vm975_vm5, %v976_v0, %v3654_v35 }
  0xcb   : > { %v715_v51 = vand.u32 2139095040, %v3673_v47  ;;  %2866 = vlog2.f32 %v489_v40  ;;  %v978_v56 = vadd.s32 %v977_v53, %v973_v41  ;;  %v439_v49 = vxor.u32 %v431_v43, %v423_v2 }
  0xcc   : > { %2868 = vcosq.f32 %v903_v52  ;;  %v665_v57 = vadd.s32 %v3592_v23, %v3597_v31  ;;  %v681_v60 = vsub.s32 32, %v680_v38  ;;  %v686_v6 = vadd.s32 127, %v685_v50 }
  0xcd   : > { %2870 = vsinq.f32 %v903_v52  ;;  %v979_v42 = vadd.s32 536870912, %v978_v56  ;;  %v330_v54 = vshrl.u32 %v3438_v20, 16  ;;  %v421_v14 = vmul.u32 2146121005, %v413_v62 }
  0xce   : > { %v484_v17 = vmul.f32 5.9604645e-08, %v476_v32  ;;  %v716_v19 = vshrl.u32 %v715_v51, 23  ;;  %v682_v27 = vshll.u32 %v3633_v37, %v680_v38  ;;  %v683_v28 = vshrl.u32 %v665_v57, %v681_v60 }
  0xcf   : > { %v3692_v21 = vshrl.u32 %v979_v42, 30  ;;  %v687_v44 = vshll.u32 %v686_v6, 23  ;;  %v338_v2 = vxor.u32 %v330_v54, %v3438_v20  ;;  %v447_v34 = vmul.u32 2221713035, %v439_v49 }
  0xd0   : > { %v429_v59 = vshrl.u32 %v421_v14, 15  ;;  %v901_v23 = vsub.s32 4, %v3559_v9  ;;  %v492_v31 = vsub.f32 1.0, %v484_v17  ;;  %v2555_v35 = vadd.s32 4294967169, %v716_v19 }
  0xd1   : > { %v981_v26 = vshll.u32 %v3692_v21, 30  ;;  %v684_v55 = vor.u32 %v683_v28, %v682_v27  ;;  %v688_v29 = vor.u32 4788187, %v687_v44  ;;  %v346_v46 = vmul.u32 2146121005, %v338_v2 }
  0xd2   : > { %v455_v39 = vshrl.u32 %v447_v34, 16  ;;  %v3698_v10 = vxor.u32 %v429_v59, %v421_v14  ;;  %v902_v37 = vsel %vm817_vm14, %v901_v23, %v3559_v9  ;;  %2872 = vlog2.f32 %v492_v31 }
  0xd3   : > { %v3703_v20 = vsub.s32 %v978_v56, %v981_v26  ;;  %v722_v38 = vadd.s32 1, %v2555_v35  ;;  %v279_v40 = vadd.s32 56, %v3389_v1  ;;  %v689_v0 = vand.u32 2147483647, %v688_v29 }
  0xd4   : > { %v691_v43 = vcvt.s32.f32 %v684_v55  ;;  %v712_v50 = vand.u32 2147483647, %v3673_v47  ;;  %v904_v62 = vsel %vm3662_vm4, 0, %v902_v37  ;;  %v354_v32 = vshrl.u32 %v346_v46, 15 }
  0xd5   : > { %v463_v53 = vxor.u32 %v455_v39, %v447_v34  ;;  %v908_v51 = vand.u32 3, %v904_v62  ;;  %v984_v56 = vsub.s32 0, %v3703_v20  ;;  %vm723_vm6 = vcmp.gt.s32.totalorder %v722_v38, 0 }
  0xd6   : > { %v445_v49 = vmul.u32 2221713035, %v3698_v10  ;;  %vm561_vm7 = vcmp.eq.f32.partialorder %v3669_v45, inf  ;;  %v3718_v6 = vadd.s32 %v3392_v3, %v279_v40  ;;  %vm563_vm8 = vcmp.eq.f32.partialorder %v3669_v45, 0.0 }
  0xd7   : > { %v2865_v12 = vpop.eup %2864  ;;  %v564_v5 = vand.u32 2147483648, %v3669_v45  ;;  %vm907_vm9 = vweird.f32 %v3440_v25  ;;  %v692_v42 = vmul.f32 %v691_v43, %v689_v0  ;;  %v719_v54 = vand.u32 8388607, %v712_v50 }
  0xd8   : > { %v2867_v41 = vpop.eup %2866  ;;  %v560_v57 = vmul.f32 %v2865_v12, %v3669_v45  ;;  %v362_v19 = vxor.u32 %v354_v32, %v346_v46  ;;  %v724_v27 = vsel %vm723_vm6, %v722_v38, 0  ;;  %vm910_vm10 = vcmp.eq.s32.totalorder %v908_v51, 0 }
  0xd9   : > { %v3707_v52 = vpop.eup %2868  ;;  %v522_v60 = vmul.f32 0.6931472, %v2867_v41  ;;  %vm913_vm11 = vcmp.eq.s32.totalorder %v908_v51, 2  ;;  %v2564_v28 = vmin.u32 %v984_v56, %v3703_v20  ;;  %v503_v44 = vshrl.u32 %v463_v53, 8 }
  0xda   : > { %v3711_v9 = vpop.eup %2870  ;;  %v914_v17 = vxor.u32 2147483648, %v3707_v52  ;;  %v562_v2 = vsel %vm561_vm7, %v3669_v45, %v560_v57  ;;  %vm909_vm12 = vcmp.lt.s32.totalorder %v908_v51, 2  ;;  %v3735_v59 = vshrl.u32 %v445_v49, 16 }
  0xdb   : > { %v911_v14 = vxor.u32 2147483648, %v3711_v9  ;;  %v3731_v34 = vmul.f32 -2.0, %v522_v60  ;;  %vm611_vm13 = vcmp.lt.s32.totalorder %v3470_v18, 0  ;;  %v693_v23 = vxor.u32 2147483648, %v692_v42 }
  0xdc   : > { %v986_v31 = vclz %v2564_v28  ;;  %v726_v26 = vand.u32 31, %v724_v27  ;;  %v915_v55 = vsel %vm913_vm11, %v914_v17, %v3711_v9  ;;  %v370_v29 = vmul.u32 2221713035, %v362_v19 }
  0xdd   : > { %v912_v35 = vsel %vm910_vm10, %v3707_v52, %v911_v14  ;;  %v720_v46 = vor.u32 8388608, %v719_v54  ;;  %v3746_v39 = vsel %vm563_vm8, %v564_v5, %v562_v2  ;;  %v511_v38 = vcvt.s32.f32 %v503_v44 }
  0xde   : > { %v2565_v37 = vadd.s32 4294967294, %v986_v31  ;;  %v1742_v41 = vadd.s32 3, %v904_v62  ;;  %2874 = vrsqrt.f32 %v3731_v34  ;;  %vm3752_vm14 = vcmp.le.f32.partialorder %v609_v48, 0.7853982 }
  0xdf   : > { %v2873_v40 = vpop.eup %2872  ;;  %v974_v43 = vadd.s32 %v3653_v8, %v3667_v36  ;;  %v916_v45 = vsel %vm909_vm12, %v912_v35, %v915_v55  ;;  %v694_v32 = vsel %vm611_vm13, %v693_v23, %v692_v42  ;;  %v727_v53 = vsub.s32 32, %v726_v26 }
  0xe0   : > { %vm2566_vm15 = vcmp.lt.s32.totalorder %v2565_v37, 0  ;;  %v378_v62 = vshrl.u32 %v370_v29, 16  ;;  %v3761_v57 = vshll.u32 %v720_v46, 8  ;;  %v335_v60 = vshrl.u32 %v3464_v4, 16 }
  0xe1   : > { %v989_v56 = vsel %vm2566_vm15, 0, %v2565_v37  ;;  %v695_v48 = vsub.s32 4, %v3624_v61  ;;  %v528_v5 = vmul.f32 0.6931472, %v2873_v40  ;;  %v725_v54 = vshrl.u32 %v724_v27, 5 }
  0xe2   : > { %v519_v19 = vmul.f32 5.9604645e-08, %v511_v38  ;;  %v917_v8 = vsel %vm907_vm9, nan, %v916_v45  ;;  %v3767_v36 = vand.u32 3, %v1742_v41  ;;  %v697_v51 = vsel %vm3752_vm14, %v3470_v18, %v694_v32 }
  0xe3   : > { %v994_v42 = vsub.s32 4294967266, %v989_v56  ;;  %v729_v28 = vshll.u32 %v3136_v11, %v726_v26  ;;  %v730_v44 = vshrl.u32 %v3137_v13, %v727_v53  ;;  %v732_v2 = vshll.u32 %v3137_v13, %v726_v26 }
  0xe4   : > { %v733_v23 = vshrl.u32 %v3138_v15, %v727_v53  ;;  %v990_v27 = vsub.s32 32, %v989_v56  ;;  %v3776_v31 = vxor.u32 %v378_v62, %v370_v29  ;;  %v735_v35 = vshll.u32 %v3138_v15, %v726_v26 }
  0xe5   : > { %v343_v55 = vxor.u32 %v335_v60, %v3464_v4  ;;  %v3781_v46 = vmul.f32 %v917_v8, %v3746_v39  ;;  %v696_v37 = vsel %vm611_vm13, %v695_v48, %v3624_v61  ;;  %v3786_v38 = vmul.f32 -2.0, %v528_v5 }
  0xe6   : > { %v995_v40 = vadd.s32 127, %v994_v42  ;;  %vm1745_vm0 = vcmp.eq.s32.totalorder %v3767_v36, 0  ;;  %2876 = vcosq.f32 %v697_v51  ;;  %v736_v29 = vshrl.u32 %v3139_v22, %v727_v53 }
  0xe7   : > { %vm744_vm1 = vcmp.lt.s32.totalorder %v725_v54, 1  ;;  %v991_v41 = vshll.u32 %v3703_v20, %v989_v56  ;;  %v728_v4 = vshrl.u32 %v3136_v11, %v727_v53  ;;  %v731_v45 = vor.u32 %v730_v44, %v729_v28 }
  0xe8   : > { %v734_v32 = vor.u32 %v733_v23, %v732_v2  ;;  %v992_v62 = vshrl.u32 %v974_v43, %v990_v27  ;;  %v737_v60 = vor.u32 %v736_v29, %v735_v35  ;;  %v738_v8 = vshll.u32 %v3139_v22, %v726_v26 }
  0xe9   : > { %v739_v61 = vshrl.u32 %v3140_v24, %v727_v53  ;;  %v996_v48 = vshll.u32 %v995_v40, 23  ;;  %v741_v5 = vshll.u32 %v3140_v24, %v726_v26  ;;  %v742_v42 = vshrl.u32 %v3141_v30, %v727_v53 }
  0xea   : > { %vm747_vm2 = vcmp.lt.s32.totalorder %v725_v54, 4  ;;  %vm745_vm3 = vcmp.lt.s32.totalorder %v725_v54, 2  ;;  %vm746_vm4 = vcmp.lt.s32.totalorder %v725_v54, 3  ;;  %v748_v43 = vsel %vm744_vm1, %v728_v4, %v731_v45 }
  0xeb   : > { %v740_v12 = vor.u32 %v739_v61, %v738_v8  ;;  %v749_v20 = vsel %vm747_vm2, %v737_v60, 2102212464  ;;  %v2875_v56 = vpop.eup %2874  ;;  %v743_v28 = vor.u32 %v742_v42, %v741_v5  ;;  %v752_v2 = vsel %vm744_vm1, %v731_v45, %v734_v32 }
  0xec   : > { %v750_v44 = vsel %vm746_vm4, %v734_v32, %v749_v20  ;;  %vm1748_vm5 = vcmp.eq.s32.totalorder %v3767_v36, 2  ;;  %v993_v23 = vor.u32 %v992_v62, %v991_v41  ;;  %v756_v53 = vsel %vm744_vm1, %v734_v32, %v737_v60 }
  0xed   : > { %v753_v26 = vsel %vm747_vm2, %v740_v12, 920167782  ;;  %v997_v27 = vor.u32 4788187, %v996_v48  ;;  %v757_v40 = vsel %vm747_vm2, %v743_v28, 1326507024  ;;  %v751_v8 = vsel %vm745_vm3, %v748_v43, %v750_v44 }
  0xee   : > { %v754_v35 = vsel %vm746_vm4, %v737_v60, %v753_v26  ;;  %v351_v29 = vmul.u32 2146121005, %v343_v55  ;;  %v758_v61 = vsel %vm746_vm4, %v740_v12, %v757_v40  ;;  %v3808_v45 = vmul.f32 6.2831855, %v519_v19 }
  0xef   : > { %v755_v4 = vsel %vm745_vm3, %v752_v2, %v754_v35  ;;  %v759_v41 = vsel %vm745_vm3, %v756_v53, %v758_v61  ;;  %v698_v60 = vsel %vm3752_vm14, 0, %v696_v37  ;;  %2878 = vsinq.f32 %v697_v51 }
  0xf0   : > { %v3812_v62 = vmul.u32.u64.low %v3761_v57, %v755_v4  ;;  %v3813_v5 = vmul.u32.u64.high %v3761_v57, %v755_v4, %v3812_v62  ;;  %v359_v32 = vshrl.u32 %v351_v29, 15  ;;  %vm1744_vm6 = vcmp.lt.s32.totalorder %v3767_v36, 2 }
  0xf1   : > { %v3819_v55 = vmul.u32.u64.low %v3761_v57, %v759_v41  ;;  %v3820_v48 = vmul.u32.u64.high %v3761_v57, %v759_v41, %v3819_v55  ;;  %v1747_v12 = vsel %vm1745_vm0, %v3707_v52, %v911_v14  ;;  %v1230_v19 = vand.u32 2139095040, %v3808_v45 }
  0xf2   : > { %v367_v54 = vxor.u32 %v359_v32, %v351_v29  ;;  %v1750_v0 = vsel %vm1748_vm5, %v914_v17, %v3711_v9  ;;  %v998_v51 = vand.u32 2147483647, %v997_v27  ;;  %v1000_v37 = vcvt.s32.f32 %v993_v23 }
  0xf3   : > { %v767_v42 = vmul.u32 %v3761_v57, %v751_v8  ;;  %v3835_v20 = vpop.eup %2876  ;;  %v466_v28 = vshrl.u32 %v3776_v31, 8  ;;  %v770_v43 = vadd.s32 1, %v3813_v5  ;;  %v1231_v44 = vshrl.u32 %v1230_v19, 23 }
  0xf4   : > { %v375_v14 = vmul.u32 2221713035, %v367_v54  ;;  %v1534_v2 = vadd.s32 3, %v698_v60  ;;  %2880 = vrsqrt.f32 %v3786_v38  ;;  %vm920_vm7 = vcmp.lt.s32.totalorder %v3498_v63, 0 }
  0xf5   : > { %vm769_vm8 = vc.u32 %v3820_v48, %v3812_v62  ;;  %v546_v52 = vmul.f32 %v2875_v56, %v3731_v34  ;;  %v2575_v57 = vadd.s32 4294967169, %v1231_v44  ;;  %v1751_v31 = vsel %vm1744_vm6, %v1747_v12, %v1750_v0 }
  0xf6   : > { %v771_v9 = vsel %vm769_vm8, %v770_v43, %v3813_v5  ;;  %v383_v17 = vshrl.u32 %v375_v14, 16  ;;  %vm547_vm10 = vcmp.eq.f32.partialorder %v3731_v34, inf  ;;  %vm3850_vm11 = vcmp.le.f32.partialorder %v918_v58, 0.7853982 }
  0xf7   : > { %v1001_v26 = vmul.f32 %v1000_v37, %v998_v51  ;;  %v772_v53 = vadd.s32 %v771_v9, %v767_v42  ;;  %v3855_v27 = vmul.f32 0.1, %v3781_v46  ;;  %v474_v56 = vcvt.s32.f32 %v466_v28 }
  0xf8   : > { %v1237_v35 = vadd.s32 1, %v2575_v57  ;;  %v333_v40 = vshrl.u32 %v3602_v33, 16  ;;  %v3858_v29 = vand.u32 3, %v698_v60  ;;  %v3860_v36 = vand.u32 3, %v1534_v2 }
  0xf9   : > { %v1004_v8 = vsub.s32 4, %v3692_v21  ;;  %v773_v4 = vadd.s32 536870912, %v772_v53  ;;  %v1752_v58 = vsel %vm907_vm9, nan, %v1751_v31  ;;  %v548_v61 = vsel %vm547_vm10, %v3731_v34, %v546_v52 }
  0xfa   : > { %v550_v41 = vand.u32 2147483648, %v3731_v34  ;;  %v391_v46 = vxor.u32 %v383_v17, %v375_v14  ;;  %vm549_vm12 = vcmp.eq.f32.partialorder %v3731_v34, 0.0  ;;  %v1002_v5 = vxor.u32 2147483648, %v1001_v26 }
  0xfb   : > { %v3868_v32 = vshrl.u32 %v773_v4, 30  ;;  %vm1238_vm13 = vcmp.gt.s32.totalorder %v1237_v35, 0  ;;  %v482_v60 = vmul.f32 5.9604645e-08, %v474_v56  ;;  %v1227_v55 = vand.u32 2147483647, %v3808_v45 }
  0xfc   : > { %v1239_v12 = vsel %vm1238_vm13, %v1237_v35, 0  ;;  %v341_v54 = vxor.u32 %v333_v40, %v3602_v33  ;;  %vm704_vm14 = vcmp.eq.s32.totalorder %v3858_v29, 0  ;;  %v1005_v25 = vsel %vm920_vm7, %v1004_v8, %v3692_v21  ;;  %v2879_v0 = vpop.eup %2878 }
  0xfd   : > { %v775_v19 = vshll.u32 %v3868_v32, 30  ;;  %v461_v34 = vxor.u32 %v3735_v59, %v445_v49  ;;  %v2275_v51 = vmul.f32 %v1752_v58, %v3746_v39  ;;  %v3881_v37 = vsel %vm549_vm12, %v550_v41, %v548_v61 }
  0xfe   : > { %vm707_vm9 = vcmp.eq.s32.totalorder %v3858_v29, 2  ;;  %v471_v33 = vshrl.u32 %v391_v46, 8  ;;  %v708_v42 = vxor.u32 2147483648, %v3835_v20  ;;  %v1003_v28 = vsel %vm920_vm7, %v1002_v5, %v1001_v26 }
  0xff   : > { %v3887_v21 = vsub.s32 %v772_v53, %v775_v19  ;;  %v1241_v43 = vand.u32 31, %v1239_v12  ;;  %v3891_v10 = vsel %vm3850_vm11, 0, %v1005_v25  ;;  %v490_v49 = vsub.f32 1.0, %v482_v60 }
 0x100   : > { %v1234_v59 = vand.u32 8388607, %v1227_v55  ;;  %v349_v39 = vmul.u32 2146121005, %v341_v54  ;;  %vm1537_vm15 = vcmp.eq.s32.totalorder %v3860_v36, 0  ;;  %vm1540_vm0 = vcmp.eq.s32.totalorder %v3860_v36, 2 }
 0x101   : > { %v778_v14 = vsub.s32 0, %v3887_v21  ;;  %v501_v44 = vshrl.u32 %v461_v34, 8  ;;  %v3898_v2 = vpop.eup %2880  ;;  %v3900_v52 = vmul.f32 0.1, %v2275_v51  ;;  %v705_v9 = vxor.u32 2147483648, %v2879_v0 }
 0x102   : > { %v1006_v17 = vsel %vm3850_vm11, %v3498_v63, %v1003_v28  ;;  %v479_v57 = vcvt.s32.f32 %v471_v33  ;;  %v709_v31 = vsel %vm707_vm9, %v708_v42, %v2879_v0  ;;  %v3908_v26 = vadd.s32 3, %v3891_v10 }
 0x103   : > { %v2556_v53 = vmin.u32 %v778_v14, %v3887_v21  ;;  %v1242_v56 = vsub.s32 32, %v1241_v43  ;;  %v3911_v35 = vsel %vm1540_vm0, %v708_v42, %v2879_v0  ;;  %2882 = vlog2.f32 %v490_v49 }
 0x104   : > { %v1235_v40 = vor.u32 8388608, %v1234_v59  ;;  %v357_v8 = vshrl.u32 %v349_v39, 15  ;;  %2884 = vcosq.f32 %v1006_v17  ;;  %v3913_v58 = vshrl.u32 %v1239_v12, 5 }
 0x105   : > { %v780_v4 = vclz %v2556_v53  ;;  %v509_v23 = vcvt.s32.f32 %v501_v44  ;;  %vm703_vm1 = vcmp.lt.s32.totalorder %v3858_v29, 2  ;;  %v706_v61 = vsel %vm704_vm14, %v3835_v20, %v705_v9 }
 0x106   : > { %v3922_v41 = vsel %vm1537_vm15, %v3835_v20, %v705_v9  ;;  %2886 = vsinq.f32 %v1006_v17  ;;  %v487_v46 = vmul.f32 5.9604645e-08, %v479_v57  ;;  %v1244_v60 = vshll.u32 %v3136_v11, %v1241_v43 }
 0x107   : > { %v2557_v5 = vadd.s32 4294967294, %v780_v4  ;;  %v1245_v12 = vshrl.u32 %v3137_v13, %v1242_v56  ;;  %v1247_v54 = vshll.u32 %v3137_v13, %v1241_v43  ;;  %v768_v25 = vadd.s32 %v3812_v62, %v3820_v48 }
 0x108   : > { %v1248_v19 = vshrl.u32 %v3138_v15, %v1242_v56  ;;  %v3930_v34 = vshll.u32 %v1235_v40, 8  ;;  %v3932_v0 = vxor.u32 %v357_v8, %v349_v39  ;;  %v1250_v20 = vshll.u32 %v3138_v15, %v1241_v43 }
 0x109   : > { %vm2558_vm2 = vcmp.lt.s32.totalorder %v2557_v5, 0  ;;  %vm1259_vm3 = vcmp.lt.s32.totalorder %v3913_v58, 1  ;;  %v517_v51 = vmul.f32 5.9604645e-08, %v509_v23  ;;  %v495_v42 = vsub.f32 1.0, %v487_v46 }
 0x10a   : > { %v783_v33 = vsel %vm2558_vm2, 0, %v2557_v5  ;;  %v1243_v28 = vshrl.u32 %v3136_v11, %v1242_v56  ;;  %v1251_v49 = vshrl.u32 %v3139_v22, %v1242_v56  ;;  %vm701_vm4 = vweird.f32 %v3470_v18 }
 0x10b   : > { %vm1536_vm5 = vcmp.lt.s32.totalorder %v3860_v36, 2  ;;  %v784_v62 = vsub.s32 32, %v783_v33  ;;  %v788_v48 = vsub.s32 4294967266, %v783_v33  ;;  %v1246_v59 = vor.u32 %v1245_v12, %v1244_v60 }
 0x10c   : > { %v1249_v39 = vor.u32 %v1248_v19, %v1247_v54  ;;  %v785_v14 = vshll.u32 %v3887_v21, %v783_v33  ;;  %v1253_v44 = vshll.u32 %v3139_v22, %v1241_v43  ;;  %v1254_v9 = vshrl.u32 %v3140_v24, %v1242_v56 }
 0x10d   : > { %v1256_v17 = vshll.u32 %v3140_v24, %v1241_v43  ;;  %v786_v57 = vshrl.u32 %v768_v25, %v784_v62  ;;  %v789_v53 = vadd.s32 127, %v788_v48  ;;  %v1252_v40 = vor.u32 %v1251_v49, %v1250_v20 }
 0x10e   : > { %v1257_v8 = vshrl.u32 %v3141_v30, %v1242_v56  ;;  %v1255_v4 = vor.u32 %v1254_v9, %v1253_v44  ;;  %vm1260_vm6 = vcmp.lt.s32.totalorder %v3913_v58, 2  ;;  %vm1261_vm7 = vcmp.lt.s32.totalorder %v3913_v58, 3 }
 0x10f   : > { %vm1262_vm8 = vcmp.lt.s32.totalorder %v3913_v58, 4  ;;  %v790_v23 = vshll.u32 %v789_v53, 23  ;;  %v1263_v46 = vsel %vm1259_vm3, %v1243_v28, %v1246_v59  ;;  %2888 = vlog2.f32 %v495_v42 }
 0x110   : > { %v1258_v21 = vor.u32 %v1257_v8, %v1256_v17  ;;  %v1264_v43 = vsel %vm1262_vm8, %v1252_v40, 2102212464  ;;  %v1267_v56 = vsel %vm1259_vm3, %v1246_v59, %v1249_v39  ;;  %v1268_v60 = vsel %vm1262_vm8, %v1255_v4, 920167782  ;;  %v2883_v12 = vpop.eup %2882 }
 0x111   : > { %v1265_v5 = vsel %vm1261_vm7, %v1249_v39, %v1264_v43  ;;  %v710_v54 = vsel %vm703_vm1, %v706_v61, %v709_v31  ;;  %v787_v25 = vor.u32 %v786_v57, %v785_v14  ;;  %v1269_v19 = vsel %vm1261_vm7, %v1252_v40, %v1268_v60  ;;  %v3964_v33 = vpop.eup %2884 }
 0x112   : > { %v1271_v20 = vsel %vm1259_vm3, %v1249_v39, %v1252_v40  ;;  %v791_v42 = vor.u32 4788187, %v790_v23  ;;  %v1266_v28 = vsel %vm1260_vm6, %v1263_v46, %v1265_v5  ;;  %v1270_v49 = vsel %vm1260_vm6, %v1267_v56, %v1269_v19 }
 0x113   : > { %v1272_v29 = vsel %vm1262_vm8, %v1258_v21, 1326507024  ;;  %v3972_v31 = vpop.eup %2886  ;;  %v3977_v62 = vmul.u32.u64.low %v3930_v34, %v1270_v49  ;;  %v3978_v48 = vmul.u32.u64.high %v3930_v34, %v1270_v49, %v3977_v62  ;;  %v373_v59 = vmul.u32 2221713035, %v3932_v0 }
 0x114   : > { %v1273_v61 = vsel %vm1261_vm7, %v1255_v4, %v1272_v29  ;;  %vm568_vm10 = vcmp.eq.f32.partialorder %v3786_v38, inf  ;;  %v3984_v39 = vand.u32 3, %v3891_v10  ;;  %v3988_v44 = vmul.f32 6.2831855, %v517_v51 }
 0x115   : > { %v1274_v14 = vsel %vm1260_vm6, %v1271_v20, %v1273_v61  ;;  %v567_v9 = vmul.f32 %v3898_v2, %v3786_v38  ;;  %v3993_v17 = vand.u32 3, %v3908_v26  ;;  %vm714_vm11 = vcmp.lt.s32.totalorder %v3673_v47, 0 }
 0x116   : > { %v3997_v0 = vmul.u32.u64.low %v3930_v34, %v1274_v14  ;;  %v3998_v57 = vmul.u32.u64.high %v3930_v34, %v1274_v14, %v3997_v0  ;;  %v711_v10 = vsel %vm701_vm4, nan, %v710_v54  ;;  %v1543_v58 = vsel %vm1536_vm5, %v3922_v41, %v3911_v35 }
 0x117   : > { %v794_v51 = vcvt.s32.f32 %v787_v25  ;;  %v1282_v2 = vmul.u32 %v3930_v34, %v1266_v28  ;;  %v792_v53 = vand.u32 2147483647, %v791_v42  ;;  %v1285_v26 = vadd.s32 1, %v3978_v48 }
 0x118   : > { %v381_v40 = vshrl.u32 %v373_v59, 16  ;;  %v1024_v8 = vand.u32 2139095040, %v3988_v44  ;;  %vm570_vm12 = vcmp.eq.f32.partialorder %v3786_v38, 0.0  ;;  %v571_v4 = vand.u32 2147483648, %v3786_v38 }
 0x119   : > { %vm1013_vm13 = vcmp.eq.s32.totalorder %v3984_v39, 0  ;;  %vm4014_vm14 = vcmp.le.f32.partialorder %v712_v50, 0.7853982  ;;  %v4625_v35 = vmul.u32 256, %v3718_v6  ;;  %v1544_v34 = vsel %vm701_vm4, nan, %v1543_v58 }
 0x11a   : > { %v569_v23 = vsel %vm568_vm10, %v3786_v38, %v567_v9  ;;  %vm1016_vm9 = vcmp.eq.s32.totalorder %v3984_v39, 2  ;;  %vm1284_vm15 = vc.u32 %v3998_v57, %v3977_v62  ;;  %v1433_v50 = vmul.f32 %v711_v10, %v3881_v37 }
 0x11b   : > { %v310_v41 = vadd.s32 %v4625_v35, %v3396_v7  ;;  %vm1012_vm0 = vcmp.lt.s32.totalorder %v3984_v39, 2  ;;  %v798_v21 = vsub.s32 4, %v3868_v32  ;;  %v1286_v6 = vsel %vm1284_vm15, %v1285_v26, %v3978_v48 }
 0x11c   : > { %v1025_v46 = vshrl.u32 %v1024_v8, 23  ;;  %vm1848_vm1 = vcmp.lt.s32.totalorder %v3993_v17, 2  ;;  %v524_v18 = vmul.f32 0.6931472, %v2883_v12  ;;  %v795_v43 = vmul.f32 %v794_v51, %v792_v53  ;;  %v2889_v19 = vpop.eup %2888 }
 0x11d   : > { %v1287_v5 = vadd.s32 %v1286_v6, %v1282_v2  ;;  %v389_v56 = vxor.u32 %v381_v40, %v373_v59  ;;  %v4036_v60 = vsel %vm570_vm12, %v571_v4, %v569_v23  ;;  %vm1849_vm2 = vcmp.eq.s32.totalorder %v3993_v17, 0 }
 0x11e   : > { %v2567_v54 = vadd.s32 4294967169, %v1025_v46  ;;  %v318_v25 = vmul.u32 2, %v310_v41  ;;  %v2273_v20 = vmul.f32 %v1544_v34, %v3881_v37  ;;  %v1017_v42 = vxor.u32 2147483648, %v3964_v33 }
 0x11f   : > { %vm1852_vm3 = vcmp.eq.s32.totalorder %v3993_v17, 2  ;;  %v1288_v28 = vadd.s32 536870912, %v1287_v5  ;;  %v4042_v12 = vmul.f32 0.1, %v1433_v50  ;;  %vm1010_vm4 = vweird.f32 %v3498_v63 }
 0x120   : > { %v1014_v38 = vxor.u32 2147483648, %v3972_v31  ;;  %v799_v49 = vsel %vm714_vm11, %v798_v21, %v3868_v32  ;;  %v1031_v29 = vadd.s32 1, %v2567_v54  ;;  %v4049_v61 = vmul.f32 -2.0, %v524_v18 }
 0x121   : > { %v796_v48 = vxor.u32 2147483648, %v795_v43  ;;  %v4051_v37 = vshrl.u32 %v1288_v28, 30  ;;  %v469_v59 = vshrl.u32 %v389_v56, 8  ;;  %v534_v14 = vmul.f32 0.6931472, %v2889_v19 }
 0x122   : > { %vm1032_vm5 = vcmp.gt.s32.totalorder %v1031_v29, 0  ;;  %v328_v9 = vadd.s32 %v3403_v16, %v318_v25  ;;  %v277_v0 = vadd.s32 40, %v3389_v1  ;;  %v1018_v10 = vsel %vm1016_vm9, %v1017_v42, %v3972_v31 }
 0x123   : > { %v801_v32 = vsel %vm4014_vm14, 0, %v799_v49  ;;  %v1290_v58 = vshll.u32 %v4051_v37, 30  ;;  %v1033_v51 = vsel %vm1032_vm5, %v1031_v29, 0  ;;  %v1015_v2 = vsel %vm1013_vm13, %v3964_v33, %v1014_v38 }
 0x124   : > { %v1851_v53 = vsel %vm1849_vm2, %v3964_v33, %v1014_v38  ;;  %v1854_v1 = vsel %vm1852_vm3, %v1017_v42, %v3972_v31  ;;  %v1021_v26 = vand.u32 2147483647, %v3988_v44  ;;  %v797_v40 = vsel %vm714_vm11, %v796_v48, %v795_v43 }
 0x125   : > { %v4073_v8 = vsub.s32 %v1287_v5, %v1290_v58  ;;  %v477_v4 = vcvt.s32.f32 %v469_v59  ;;  %v336_v35 = vshrl.u32 %v328_v9, 16  ;;  %v4075_v41 = vmul.f32 0.1, %v2273_v20 }
 0x126   : > { %v1638_v34 = vadd.s32 3, %v801_v32  ;;  %v4077_v23 = vmul.f32 -2.0, %v534_v14  ;;  %v1035_v50 = vand.u32 31, %v1033_v51  ;;  %v1019_v33 = vsel %vm1012_vm0, %v1015_v2, %v1018_v10 }
 0x127   : > { %2890 = vrsqrt.f32 %v4049_v61  ;;  %v557_v31 = vand.u32 2147483648, %v4049_v61  ;;  %v1293_v21 = vsub.s32 0, %v4073_v8  ;;  %v1855_v6 = vsel %vm1848_vm1, %v1851_v53, %v1854_v1 }
 0x128   : > { %v800_v46 = vsel %vm4014_vm14, %v3673_v47, %v797_v40  ;;  %v1028_v18 = vand.u32 8388607, %v1021_v26  ;;  %v400_v43 = vadd.s32 1, %v328_v9  ;;  %v4092_v5 = vmul.f32 5.9604645e-08, %v477_v4 }
 0x129   : > { %v2576_v39 = vmin.u32 %v1293_v21, %v4073_v8  ;;  %v4094_v56 = vxor.u32 %v336_v35, %v328_v9  ;;  %v289_v54 = vadd.s32 %v3392_v3, %v277_v0  ;;  %v4097_v25 = vand.u32 3, %v801_v32 }
 0x12a   : > { %v4099_v17 = vand.u32 3, %v1638_v34  ;;  %2892 = vrsqrt.f32 %v4077_v23  ;;  %v1036_v36 = vsub.s32 32, %v1035_v50  ;;  %v4104_v19 = vsel %vm1010_vm4, nan, %v1019_v33 }
 0x12b   : > { %v4108_v20 = vsel %vm1010_vm4, nan, %v1855_v6  ;;  %2894 = vcosq.f32 %v800_v46  ;;  %v1295_v42 = vclz %v2576_v39  ;;  %v1283_v3 = vadd.s32 %v3977_v62, %v3998_v57 }
 0x12c   : > { %2896 = vsinq.f32 %v800_v46  ;;  %v1029_v28 = vor.u32 8388608, %v1028_v18  ;;  %v408_v38 = vshrl.u32 %v400_v43, 16  ;;  %v493_v29 = vsub.f32 1.0, %v4092_v5 }
 0x12d   : > { %v2577_v49 = vadd.s32 4294967294, %v1295_v42  ;;  %v352_v48 = vmul.u32 2146121005, %v4094_v56  ;;  %v300_v59 = vmul.u32 256, %v289_v54  ;;  %v1038_v14 = vshll.u32 %v3136_v11, %v1035_v50 }
 0x12e   : > { %v1039_v63 = vshrl.u32 %v3137_v13, %v1036_v36  ;;  %v1041_v9 = vshll.u32 %v3137_v13, %v1035_v50  ;;  %v1042_v0 = vshrl.u32 %v3138_v15, %v1036_v36  ;;  %v1034_v10 = vshrl.u32 %v1033_v51, 5 }
 0x12f   : > { %vm2578_vm6 = vcmp.lt.s32.totalorder %v2577_v49, 0  ;;  %v1047_v62 = vshll.u32 %v3139_v22, %v1035_v50  ;;  %v1048_v57 = vshrl.u32 %v3140_v24, %v1036_v36  ;;  %v1044_v58 = vshll.u32 %v3138_v15, %v1035_v50 }
 0x130   : > { %v1298_v32 = vsel %vm2578_vm6, 0, %v2577_v49  ;;  %v1045_v2 = vshrl.u32 %v3139_v22, %v1036_v36  ;;  %v416_v53 = vxor.u32 %v408_v38, %v400_v43  ;;  %v1050_v4 = vshll.u32 %v3140_v24, %v1035_v50 }
 0x131   : > { %v1299_v1 = vsub.s32 32, %v1298_v32  ;;  %v1300_v40 = vshll.u32 %v4073_v8, %v1298_v32  ;;  %v308_v35 = vadd.s32 %v300_v59, %v3396_v7  ;;  %v1303_v34 = vsub.s32 4294967266, %v1298_v32 }
 0x132   : > { %v1040_v33 = vor.u32 %v1039_v63, %v1038_v14  ;;  %v1043_v51 = vor.u32 %v1042_v0, %v1041_v9  ;;  %v1051_v21 = vshrl.u32 %v3141_v30, %v1036_v36  ;;  %v1037_v46 = vshrl.u32 %v3136_v11, %v1036_v36 }
 0x133   : > { %v1301_v6 = vshrl.u32 %v1283_v3, %v1299_v1  ;;  %v1049_v18 = vor.u32 %v1048_v57, %v1047_v62  ;;  %vm1053_vm7 = vcmp.lt.s32.totalorder %v1034_v10, 1  ;;  %vm1229_vm8 = vcmp.lt.s32.totalorder %v3808_v45, 0 }
 0x134   : > { %v2891_v39 = vpop.eup %2890  ;;  %v1304_v43 = vadd.s32 127, %v1303_v34  ;;  %v1046_v5 = vor.u32 %v1045_v2, %v1044_v58  ;;  %v4128_v8 = vshll.u32 %v1029_v28, 8  ;;  %v424_v50 = vmul.u32 2146121005, %v416_v53 }
 0x135   : > { %v1302_v54 = vor.u32 %v1301_v6, %v1300_v40  ;;  %v1052_v7 = vor.u32 %v1051_v21, %v1050_v4  ;;  %vm1055_vm10 = vcmp.lt.s32.totalorder %v1034_v10, 3  ;;  %vm1056_vm11 = vcmp.lt.s32.totalorder %v1034_v10, 4 }
 0x136   : > { %vm4132_vm12 = vcmp.le.f32.partialorder %v1227_v55, 0.7853982  ;;  %v1305_v36 = vshll.u32 %v1304_v43, 23  ;;  %vm1054_vm13 = vcmp.lt.s32.totalorder %v1034_v10, 2  ;;  %v1061_v3 = vsel %vm1053_vm7, %v1040_v33, %v1043_v51 }
 0x137   : > { %v316_v38 = vmul.u32 2, %v308_v35  ;;  %v4137_v49 = vpop.eup %2892  ;;  %v1309_v28 = vcvt.s32.f32 %v1302_v54  ;;  %v1057_v59 = vsel %vm1053_vm7, %v1037_v46, %v1040_v33  ;;  %v1058_v14 = vsel %vm1056_vm11, %v1046_v5, 2102212464 }
 0x138   : > { %v1062_v63 = vsel %vm1056_vm11, %v1049_v18, 920167782  ;;  %v4142_v9 = vpop.eup %2894  ;;  %v1306_v55 = vor.u32 4788187, %v1305_v36  ;;  %v1059_v0 = vsel %vm1055_vm10, %v1043_v51, %v1058_v14  ;;  %v1065_v57 = vsel %vm1053_vm7, %v1043_v51, %v1046_v5 }
 0x139   : > { %v1063_v62 = vsel %vm1055_vm10, %v1046_v5, %v1062_v63  ;;  %v4147_v32 = vpop.eup %2896  ;;  %vm554_vm14 = vcmp.eq.f32.partialorder %v4049_v61, inf  ;;  %v1313_v58 = vsub.s32 4, %v4051_v37  ;;  %v1066_v53 = vsel %vm1056_vm11, %v1052_v7, 1326507024 }
 0x13a   : > { %v1064_v2 = vsel %vm1054_vm13, %v1061_v3, %v1063_v62  ;;  %v360_v1 = vshrl.u32 %v352_v48, 15  ;;  %v1307_v40 = vand.u32 2147483647, %v1306_v55  ;;  %v1067_v4 = vsel %vm1055_vm10, %v1049_v18, %v1066_v53 }
 0x13b   : > { %v4157_v35 = vmul.u32.u64.low %v4128_v8, %v1064_v2  ;;  %v4158_v34 = vmul.u32.u64.high %v4128_v8, %v1064_v2, %v4157_v35  ;;  %vm807_vm9 = vcmp.eq.s32.totalorder %v4097_v25, 0  ;;  %vm810_vm15 = vcmp.eq.s32.totalorder %v4097_v25, 2 }
 0x13c   : > { %2898 = vlog2.f32 %v493_v29  ;;  %v1060_v33 = vsel %vm1054_vm13, %v1057_v59, %v1059_v0  ;;  %v1068_v51 = vsel %vm1054_vm13, %v1065_v57, %v1067_v4  ;;  %v432_v21 = vshrl.u32 %v424_v50, 15 }
 0x13d   : > { %v1310_v6 = vmul.f32 %v1309_v28, %v1307_v40  ;;  %v4166_v46 = vmul.u32.u64.low %v4128_v8, %v1068_v51  ;;  %v4167_v43 = vmul.u32.u64.high %v4128_v8, %v1068_v51, %v4166_v46  ;;  %v4170_v18 = vadd.s32 %v3403_v16, %v316_v38 }
 0x13e   : > { %v1436_v5 = vmul.f32 %v4104_v19, %v4036_v60  ;;  %v2276_v54 = vmul.f32 %v4108_v20, %v4036_v60  ;;  %vm556_vm0 = vcmp.eq.f32.partialorder %v4049_v61, 0.0  ;;  %v1314_v29 = vsel %vm1229_vm8, %v1313_v58, %v4051_v37 }
 0x13f   : > { %v440_v10 = vxor.u32 %v432_v21, %v424_v50  ;;  %vm806_vm1 = vcmp.lt.s32.totalorder %v4097_v25, 2  ;;  %v1311_v7 = vxor.u32 2147483648, %v1310_v6  ;;  %v1076_v36 = vmul.u32 %v4128_v8, %v1060_v33 }
 0x140   : > { %v1079_v16 = vadd.s32 1, %v4158_v34  ;;  %v398_v3 = vadd.s32 1, %v4170_v18  ;;  %v553_v19 = vmul.f32 %v2891_v39, %v4049_v61  ;;  %vm1640_vm2 = vcmp.lt.s32.totalorder %v4099_v17, 2 }
 0x141   : > { %v368_v60 = vxor.u32 %v360_v1, %v352_v48  ;;  %v448_v20 = vmul.u32 2221713035, %v440_v10  ;;  %vm1641_vm3 = vcmp.eq.s32.totalorder %v4099_v17, 0  ;;  %v1312_v37 = vsel %vm1229_vm8, %v1311_v7, %v1310_v6 }
 0x142   : > { %v1316_v8 = vsel %vm4132_vm12, 0, %v1314_v29  ;;  %vm1078_vm4 = vc.u32 %v4167_v43, %v4157_v35  ;;  %vm804_vm5 = vweird.f32 %v3673_v47  ;;  %v811_v39 = vxor.u32 2147483648, %v4142_v9 }
 0x143   : > { %v1315_v56 = vsel %vm4132_vm12, %v3808_v45, %v1312_v37  ;;  %v1080_v48 = vsel %vm1078_vm4, %v1079_v16, %v4158_v34  ;;  %v456_v50 = vshrl.u32 %v448_v20, 16  ;;  %v808_v38 = vxor.u32 2147483648, %v4147_v32 }
 0x144   : > { %2900 = vcosq.f32 %v1315_v56  ;;  %v1081_v28 = vadd.s32 %v1080_v48, %v1076_v36  ;;  %v406_v59 = vshrl.u32 %v398_v3, 16  ;;  %vm1644_vm6 = vcmp.eq.s32.totalorder %v4099_v17, 2 }
 0x145   : > { %2902 = vsinq.f32 %v1315_v56  ;;  %v376_v14 = vmul.u32 2221713035, %v368_v60  ;;  %v464_v63 = vxor.u32 %v456_v50, %v448_v20  ;;  %v4203_v55 = vmul.f32 0.1, %v1436_v5 }
 0x146   : > { %v4205_v0 = vmul.f32 0.1, %v2276_v54  ;;  %v555_v42 = vsel %vm554_vm14, %v4049_v61, %v553_v19  ;;  %v1082_v62 = vadd.s32 536870912, %v1081_v28  ;;  %v4210_v57 = vand.u32 3, %v1316_v8 }
 0x147   : > { %v2158_v58 = vadd.s32 3, %v1316_v8  ;;  %v504_v2 = vshrl.u32 %v464_v63, 8  ;;  %v414_v53 = vxor.u32 %v406_v59, %v398_v3  ;;  %v809_v1 = vsel %vm807_vm9, %v4142_v9, %v808_v38 }
 0x148   : > { %v812_v40 = vsel %vm810_vm15, %v811_v39, %v4147_v32  ;;  %v588_v4 = vmul.f32 %v4137_v49, %v4077_v23  ;;  %v4220_v34 = vshrl.u32 %v1082_v62, 30  ;;  %v1643_v33 = vsel %vm1641_vm3, %v4142_v9, %v808_v38 }
 0x149   : > { %v1646_v51 = vsel %vm1644_vm6, %v811_v39, %v4147_v32  ;;  %v384_v21 = vshrl.u32 %v376_v14, 16  ;;  %v512_v6 = vcvt.s32.f32 %v504_v2  ;;  %v2899_v46 = vpop.eup %2898  ;;  %v558_v5 = vsel %vm556_vm0, %v557_v31, %v555_v42 }
 0x14a   : > { %vm589_vm7 = vcmp.eq.f32.partialorder %v4077_v23, inf  ;;  %vm591_vm8 = vcmp.eq.f32.partialorder %v4077_v23, 0.0  ;;  %v1084_v49 = vshll.u32 %v4220_v34, 30  ;;  %v813_v9 = vsel %vm806_vm1, %v809_v1, %v812_v40 }
 0x14b   : > { %v592_v54 = vand.u32 2147483648, %v4077_v23  ;;  %v520_v32 = vmul.f32 5.9604645e-08, %v512_v6  ;;  %v422_v29 = vmul.u32 2146121005, %v414_v53  ;;  %v1647_v10 = vsel %vm1640_vm2, %v1643_v33, %v1646_v51 }
 0x14c   : > { %vm1319_vm10 = vweird.f32 %v3808_v45  ;;  %vm1321_vm11 = vcmp.lt.s32.totalorder %v4210_v57, 2  ;;  %v2159_v61 = vand.u32 3, %v2158_v58  ;;  %v4242_v31 = vsub.s32 %v1081_v28, %v1084_v49 }
 0x14d   : > { %v590_v7 = vsel %vm589_vm7, %v4077_v23, %v588_v4  ;;  %vm1322_vm12 = vcmp.eq.s32.totalorder %v4210_v57, 0  ;;  %v392_v25 = vxor.u32 %v384_v21, %v376_v14  ;;  %v4246_v36 = vmul.f32 6.2831855, %v520_v32 }
 0x14e   : > { %v814_v16 = vsel %vm804_vm5, nan, %v813_v9  ;;  %vm1325_vm13 = vcmp.eq.s32.totalorder %v4210_v57, 2  ;;  %v530_v17 = vmul.f32 0.6931472, %v2899_v46  ;;  %v1087_v3 = vsub.s32 0, %v4242_v31 }
 0x14f   : > { %v1648_v19 = vsel %vm804_vm5, nan, %v1647_v10  ;;  %v1330_v60 = vand.u32 2147483647, %v4246_v36  ;;  %v1333_v20 = vand.u32 2139095040, %v4246_v36  ;;  %v430_v37 = vshrl.u32 %v422_v29, 15 }
 0x150   : > { %v593_v8 = vsel %vm591_vm8, %v592_v54, %v590_v7  ;;  %vm2160_vm14 = vcmp.lt.s32.totalorder %v2159_v61, 2  ;;  %vm2161_vm9 = vcmp.eq.s32.totalorder %v2159_v61, 0  ;;  %v2568_v39 = vmin.u32 %v1087_v3, %v4242_v31 }
 0x151   : > { %v2901_v56 = vpop.eup %2900  ;;  %v1434_v48 = vmul.f32 %v814_v16, %v558_v5  ;;  %vm2164_vm15 = vcmp.eq.s32.totalorder %v2159_v61, 2  ;;  %v472_v50 = vshrl.u32 %v392_v25, 8  ;;  %v1334_v38 = vshrl.u32 %v1333_v20, 23 }
 0x152   : > { %v2903_v28 = vpop.eup %2902  ;;  %v2274_v47 = vmul.f32 %v1648_v19, %v558_v5  ;;  %v1326_v59 = vxor.u32 2147483648, %v2901_v56  ;;  %v4259_v14 = vmul.f32 -2.0, %v530_v17  ;;  %v1089_v63 = vclz %v2568_v39 }
 0x153   : > { %v1323_v42 = vxor.u32 2147483648, %v2903_v28  ;;  %vm1023_vm0 = vcmp.lt.s32.totalorder %v3988_v44, 0  ;;  %v1337_v23 = vand.u32 8388607, %v1330_v60  ;;  %v334_v62 = vshrl.u32 %v4170_v18, 16 }
 0x154   : > { %v4265_v58 = vxor.u32 %v430_v37, %v422_v29  ;;  %v1327_v2 = vsel %vm1325_vm13, %v1326_v59, %v2903_v28  ;;  %v2166_v53 = vsel %vm2164_vm15, %v1326_v59, %v2903_v28  ;;  %v2569_v1 = vadd.s32 4294967294, %v1089_v63 }
 0x155   : > { %v2579_v40 = vadd.s32 4294967169, %v1334_v38  ;;  %v1324_v4 = vsel %vm1322_vm12, %v2901_v56, %v1323_v42  ;;  %v2163_v33 = vsel %vm2161_vm9, %v2901_v56, %v1323_v42  ;;  %v1077_v51 = vadd.s32 %v4157_v35, %v4167_v43 }
 0x156   : > { %v480_v21 = vcvt.s32.f32 %v472_v50  ;;  %v1328_v6 = vsel %vm1321_vm11, %v1324_v4, %v1327_v2  ;;  %v2167_v46 = vsel %vm2160_vm14, %v2163_v33, %v2166_v53  ;;  %vm2570_vm1 = vcmp.lt.s32.totalorder %v2569_v1, 0 }
 0x157   : > { %v1340_v5 = vadd.s32 1, %v2579_v40  ;;  %v1329_v49 = vsel %vm1319_vm10, nan, %v1328_v6  ;;  %v2168_v9 = vsel %vm1319_vm10, nan, %v2167_v46  ;;  %v1092_v54 = vsel %vm2570_vm1, 0, %v2569_v1 }
 0x158   : > { %v1107_v32 = vsub.s32 4, %v4220_v34  ;;  %v1093_v35 = vsub.s32 32, %v1092_v54  ;;  %v1094_v43 = vshll.u32 %v4242_v31, %v1092_v54  ;;  %v1338_v57 = vor.u32 8388608, %v1337_v23 }
 0x159   : > { %v446_v29 = vmul.u32 2221713035, %v4265_v58  ;;  %v1439_v10 = vmul.f32 %v1329_v49, %v593_v8  ;;  %v2279_v61 = vmul.f32 %v2168_v9, %v593_v8  ;;  %v1097_v7 = vsub.s32 4294967266, %v1092_v54 }
 0x15a   : > { %vm1341_vm2 = vcmp.gt.s32.totalorder %v1340_v5, 0  ;;  %v2282_v25 = vmul.f32 0.1, %v1434_v48  ;;  %v2290_v16 = vmul.f32 0.1, %v2274_v47  ;;  %v1095_v17 = vshrl.u32 %v1077_v51, %v1093_v35 }
 0x15b   : > { %v1342_v45 = vsel %vm1341_vm2, %v1340_v5, 0  ;;  %2904 = vrsqrt.f32 %v4259_v14  ;;  %v1098_v3 = vadd.s32 127, %v1097_v7  ;;  %v4288_v19 = vmul.f32 5.9604645e-08, %v480_v21 }
 0x15c   : > { %v4291_v31 = vxor.u32 %v334_v62, %v4170_v18  ;;  %v1096_v20 = vor.u32 %v1095_v17, %v1094_v43  ;;  %v4296_v37 = vsel %vm1023_vm0, %v1107_v32, %v4220_v34  ;;  %v1344_v8 = vand.u32 31, %v1342_v45 }
 0x15d   : > { %v4300_v39 = vshrl.u32 %v446_v29, 16  ;;  %v2287_v56 = vmul.f32 0.1, %v1439_v10  ;;  %v2295_v48 = vmul.f32 0.1, %v2279_v61  ;;  %v1099_v18 = vshll.u32 %v1098_v3, 23  ;;  %v2658_v28 = vpop.f32.mrf.mxu0  ;;  %v2666_v47 = vpop.f32.mrf.mxu1 }
 0x15e   : > { %vm4304_vm3 = vcmp.le.f32.partialorder %v1021_v26, 0.7853982  ;;  %v4308_v38 = vshll.u32 %v1338_v57, 8  ;;  %v4310_v34 = vshrl.u32 %v1342_v45, 5  ;;  %v1345_v59 = vsub.s32 32, %v1344_v8 }
 0x15f   : > { %v1347_v63 = vshll.u32 %v3136_v11, %v1344_v8  ;;  %v1350_v42 = vshll.u32 %v3137_v13, %v1344_v8  ;;  %v2340_v23 = vadd.f32 %v2658_v28, %v3855_v27  ;;  %v2372_v62 = vadd.f32 %v2666_v47, %v3900_v52  ;;  %v2331_v53 = vpop.f32.mrf.mxu0  ;;  %v2363_v1 = vpop.f32.mrf.mxu1 }
 0x160   : > { %v1100_v26 = vor.u32 4788187, %v1099_v18  ;;  %v1103_v2 = vcvt.s32.f32 %v1096_v20  ;;  %v1348_v40 = vshrl.u32 %v3137_v13, %v1345_v59  ;;  %v1351_v4 = vshrl.u32 %v3138_v15, %v1345_v59 }
 0x161   : > { %v1353_v33 = vshll.u32 %v3138_v15, %v1344_v8  ;;  %v1354_v51 = vshrl.u32 %v3139_v22, %v1345_v59  ;;  %2396 = vst [vmem:[%s4320_s8 + $0x10] sm:$0xff] %v2340_v23  ;;  %2404 = vst [vmem:[%s4320_s8 + $0x50] sm:$0xff] %v2372_v62  ;;  %v2332_v27 = vadd.f32 %v2331_v53, %v4042_v12  ;;  %v2659_v46 = vpop.f32.mrf.mxu0  ;;  %v2667_v5 = vpop.f32.mrf.mxu1  ;;  %vm1362_vm4 = vcmp.lt.s32.totalorder %v4310_v34, 1 }
 0x162   : > { %v2364_v52 = vadd.f32 %v2363_v1, %v4075_v41  ;;  %v1101_v21 = vand.u32 2147483647, %v1100_v26  ;;  %v1356_v6 = vshll.u32 %v3139_v22, %v1344_v8  ;;  %v1346_v49 = vshrl.u32 %v3136_v11, %v1345_v59 }
 0x163   : > { %v1349_v9 = vor.u32 %v1348_v40, %v1347_v63  ;;  %v1352_v54 = vor.u32 %v1351_v4, %v1350_v42  ;;  %v1357_v32 = vshrl.u32 %v3140_v24, %v1345_v59  ;;  %2394 = vst [vmem:[%s4320_s8] sm:$0xff] %v2332_v27  ;;  %v2343_v35 = vadd.f32 %v2659_v46, %v4203_v55  ;;  %v2334_v57 = vpop.f32.mrf.mxu0  ;;  %v2366_v10 = vpop.f32.mrf.mxu1 }
 0x164   : > { %2402 = vst [vmem:[%s4320_s8 + $0x40] sm:$0xff] %v2364_v52  ;;  %v2375_v12 = vadd.f32 %v2667_v5, %v4205_v0  ;;  %v1104_v41 = vmul.f32 %v1103_v2, %v1101_v21  ;;  %v1359_v43 = vshll.u32 %v3140_v24, %v1344_v8  ;;  %v1355_v61 = vor.u32 %v1354_v51, %v1353_v33 }
 0x165   : > { %v1358_v7 = vor.u32 %v1357_v32, %v1356_v6  ;;  %v1360_v17 = vshrl.u32 %v3141_v30, %v1345_v59  ;;  %2397 = vst [vmem:[%s4320_s8 + $0x18] sm:$0xff] %v2343_v35  ;;  %v2335_v45 = vadd.f32 %v2334_v57, %v2282_v25  ;;  %v2367_v3 = vadd.f32 %v2366_v10, %v2290_v16  ;;  %v2662_v0 = vpop.f32.mrf.mxu0  ;;  %v2670_v20 = vpop.f32.mrf.mxu1 }
 0x166   : > { %2405 = vst [vmem:[%s4320_s8 + $0x58] sm:$0xff] %v2375_v12  ;;  %v1105_v55 = vxor.u32 2147483648, %v1104_v41  ;;  %vm1363_vm5 = vcmp.lt.s32.totalorder %v4310_v34, 2  ;;  %vm1364_vm6 = vcmp.lt.s32.totalorder %v4310_v34, 3  ;;  %vm1365_vm7 = vcmp.lt.s32.totalorder %v4310_v34, 4 }
 0x167   : > { %v1361_v8 = vor.u32 %v1360_v17, %v1359_v43  ;;  %v1370_v18 = vsel %vm1362_vm4, %v1349_v9, %v1352_v54  ;;  %2395 = vst [vmem:[%s4320_s8 + $0x8] sm:$0xff] %v2335_v45  ;;  %2403 = vst [vmem:[%s4320_s8 + $0x48] sm:$0xff] %v2367_v3  ;;  %v2356_v28 = vadd.f32 %v2662_v0, %v2287_v56  ;;  %v1367_v47 = vsel %vm1365_vm7, %v1355_v61, 2102212464 }
 0x168   : > { %v2388_v25 = vadd.f32 %v2670_v20, %v2295_v48  ;;  %v1106_v16 = vsel %vm1023_vm0, %v1105_v55, %v1104_v41  ;;  %v2905_v59 = vpop.eup %2904  ;;  %v1366_v42 = vsel %vm1362_vm4, %v1346_v49, %v1349_v9  ;;  %v1371_v23 = vsel %vm1365_vm7, %v1358_v7, 920167782 }
 0x169   : > { %v1109_v63 = vsel %vm4304_vm3, %v3988_v44, %v1106_v16  ;;  %v462_v56 = vxor.u32 %v4300_v39, %v446_v29  ;;  %2400 = vst [vmem:[%s4320_s8 + $0x30] sm:$0xff] %v2356_v28  ;;  %v1368_v48 = vsel %vm1364_vm6, %v1352_v54, %v1367_v47  ;;  %v1372_v62 = vsel %vm1364_vm6, %v1355_v61, %v1371_v23 }
 0x16a   : > { %2408 = vst [vmem:[%s4320_s8 + $0x70] sm:$0xff] %v2388_v25  ;;  %2906 = vcosq.f32 %v1109_v63  ;;  %v1374_v26 = vsel %vm1362_vm4, %v1352_v54, %v1355_v61  ;;  %v1373_v2 = vsel %vm1363_vm5, %v1370_v18, %v1372_v62  ;;  %v1375_v58 = vsel %vm1365_vm7, %v1361_v8, 1326507024 }
 0x16b   : > { %2908 = vsinq.f32 %v1109_v63  ;;  %v1110_v29 = vsel %vm4304_vm3, 0, %v4296_v37  ;;  %v1376_v39 = vsel %vm1364_vm6, %v1358_v7, %v1375_v58  ;;  %v496_v40 = vsub.f32 1.0, %v4288_v19  ;;  %v2379_v58 = vpop.f32.mrf.mxu1 }
 0x16c   : > { %v4377_v53 = vmul.u32.u64.low %v4308_v38, %v1373_v2  ;;  %v4378_v1 = vmul.u32.u64.high %v4308_v38, %v1373_v2, %v4377_v53  ;;  %v1369_v4 = vsel %vm1363_vm5, %v1366_v42, %v1368_v48  ;;  %v1377_v33 = vsel %vm1363_vm5, %v1374_v26, %v1376_v39 }
 0x16d   : > { %v502_v51 = vshrl.u32 %v462_v56, 8  ;;  %v4387_v50 = vmul.u32.u64.low %v4308_v38, %v1377_v33  ;;  %v4388_v37 = vmul.u32.u64.high %v4308_v38, %v1377_v33, %v4387_v50  ;;  %v350_v27 = vmul.u32 2146121005, %v4291_v31 }
 0x16e   : > { %v1950_v52 = vadd.s32 3, %v1110_v29  ;;  %v1385_v6 = vmul.u32 %v4308_v38, %v1369_v4  ;;  %v1388_v46 = vadd.s32 1, %v4378_v1  ;;  %2910 = vlog2.f32 %v496_v40 }
 0x16f   : > { %v510_v21 = vcvt.s32.f32 %v502_v51  ;;  %v574_v5 = vmul.f32 %v2905_v59, %v4259_v14  ;;  %vm575_vm8 = vcmp.eq.f32.partialorder %v4259_v14, inf  ;;  %vm1387_vm10 = vc.u32 %v4388_v37, %v4377_v53 }
 0x170   : > { %v358_v34 = vshrl.u32 %v350_v27, 15  ;;  %v1114_v49 = vand.u32 3, %v1110_v29  ;;  %v1951_v9 = vand.u32 3, %v1950_v52  ;;  %v1389_v31 = vsel %vm1387_vm10, %v1388_v46, %v4378_v1 }
 0x171   : > { %v518_v19 = vmul.f32 5.9604645e-08, %v510_v21  ;;  %v1390_v32 = vadd.s32 %v1389_v31, %v1385_v6  ;;  %vm577_vm11 = vcmp.eq.f32.partialorder %v4259_v14, 0.0  ;;  %v576_v35 = vsel %vm575_vm8, %v4259_v14, %v574_v5 }
 0x172   : > { %v578_v12 = vand.u32 2147483648, %v4259_v14  ;;  %v366_v43 = vxor.u32 %v358_v34, %v350_v27  ;;  %vm1115_vm12 = vcmp.lt.s32.totalorder %v1114_v49, 2  ;;  %vm1119_vm13 = vcmp.eq.s32.totalorder %v1114_v49, 2  ;;  %v2347_v14 = vpop.f32.mrf.mxu0 }
 0x173   : > { %v4398_v54 = vmul.f32 6.2831855, %v518_v19  ;;  %v1391_v41 = vadd.s32 536870912, %v1390_v32  ;;  %vm1956_vm14 = vcmp.eq.s32.totalorder %v1951_v9, 2  ;;  %vm1116_vm9 = vcmp.eq.s32.totalorder %v1114_v49, 0 }
 0x174   : > { %vm1953_vm15 = vcmp.eq.s32.totalorder %v1951_v9, 0  ;;  %vm1952_vm0 = vcmp.lt.s32.totalorder %v1951_v9, 2  ;;  %vm1113_vm1 = vweird.f32 %v3988_v44  ;;  %v579_v18 = vsel %vm577_vm11, %v578_v12, %v576_v35 }
 0x175   : > { %v1127_v38 = vand.u32 2139095040, %v4398_v54  ;;  %v4404_v17 = vshrl.u32 %v1391_v41, 30  ;;  %v1124_v3 = vand.u32 2147483647, %v4398_v54  ;;  %v374_v42 = vmul.u32 2221713035, %v366_v43 }
 0x176   : > { %v1386_v5 = vadd.s32 %v4377_v53, %v4388_v37  ;;  %vm1332_vm8 = vcmp.lt.s32.totalorder %v4246_v36, 0  ;;  %vm1331_vm10 = vcmp.le.f32.partialorder %v1330_v60, 0.7853982 }
 0x177   : > { %v2907_v57 = vpop.eup %2906  ;;  %v1128_v10 = vshrl.u32 %v1127_v38, 23  ;;  %v1393_v8 = vshll.u32 %v4404_v17, 30  ;;  %v1131_v44 = vand.u32 8388607, %v1124_v3  ;;  %v382_v40 = vshrl.u32 %v374_v42, 16 }
 0x178   : > { %v2909_v61 = vpop.eup %2908  ;;  %v1120_v7 = vxor.u32 2147483648, %v2907_v57 }
 0x179   : > { %v1117_v45 = vxor.u32 2147483648, %v2909_v61  ;;  %v2571_v55 = vadd.s32 4294967169, %v1128_v10  ;;  %v1394_v63 = vsub.s32 %v1390_v32, %v1393_v8  ;;  %v1132_v33 = vor.u32 8388608, %v1131_v44 }
 0x17a   : > { %v1121_v0 = vsel %vm1119_vm13, %v1120_v7, %v2909_v61  ;;  %v1958_v20 = vsel %vm1956_vm14, %v1120_v7, %v2909_v61  ;;  %v390_v46 = vxor.u32 %v382_v40, %v374_v42 }
 0x17b   : > { %v1118_v28 = vsel %vm1116_vm9, %v2907_v57, %v1117_v45  ;;  %v1955_v25 = vsel %vm1953_vm15, %v2907_v57, %v1117_v45  ;;  %v1134_v16 = vadd.s32 1, %v2571_v55  ;;  %v2911_v48 = vpop.eup %2910  ;;  %v1396_v2 = vsub.s32 0, %v1394_v63 }
 0x17c   : > { %v1122_v47 = vsel %vm1115_vm12, %v1118_v28, %v1121_v0  ;;  %v1959_v59 = vsel %vm1952_vm0, %v1955_v25, %v1958_v20  ;;  %v536_v4 = vmul.f32 0.6931472, %v2911_v48  ;;  %v4420_v49 = vshll.u32 %v1132_v33, 8 }
 0x17d   : > { %v1123_v23 = vsel %vm1113_vm1, nan, %v1122_v47  ;;  %v1960_v56 = vsel %vm1113_vm1, nan, %v1959_v59  ;;  %vm1135_vm2 = vcmp.gt.s32.totalorder %v1134_v16, 0  ;;  %v2580_v1 = vmin.u32 %v1396_v2, %v1394_v63 }
 0x17e   : > { %v1437_v62 = vmul.f32 %v1123_v23, %v579_v18  ;;  %v2277_v26 = vmul.f32 %v1960_v56, %v579_v18  ;;  %v1136_v51 = vsel %vm1135_vm2, %v1134_v16, 0  ;;  %v4416_v19 = vmul.f32 -2.0, %v536_v4 }
 0x17f   : > { %v1398_v52 = vclz %v2580_v1  ;;  %v1137_v21 = vshrl.u32 %v1136_v51, 5  ;;  %v1138_v34 = vand.u32 31, %v1136_v51  ;;  %v470_v23 = vshrl.u32 %v390_v46, 8 }
 0x180   : > { %v2285_v29 = vmul.f32 0.1, %v1437_v62  ;;  %v2293_v39 = vmul.f32 0.1, %v2277_v26  ;;  %2912 = vrsqrt.f32 %v4416_v19  ;;  %v1416_v1 = vsub.s32 4, %v4404_v17 }
 0x181   : > { %v2581_v6 = vadd.s32 4294967294, %v1398_v52  ;;  %vm1156_vm4 = vcmp.lt.s32.totalorder %v1137_v21, 1  ;;  %vm1157_vm5 = vcmp.lt.s32.totalorder %v1137_v21, 2  ;;  %vm1159_vm6 = vcmp.lt.s32.totalorder %v1137_v21, 4 }
 0x182   : > { %v2348_v50 = vadd.f32 %v2347_v14, %v2285_v29  ;;  %v2380_v27 = vadd.f32 %v2379_v58, %v2293_v39  ;;  %v1139_v31 = vsub.s32 32, %v1138_v34  ;;  %v1141_v32 = vshll.u32 %v3136_v11, %v1138_v34 }
 0x183   : > { %vm2582_vm3 = vcmp.lt.s32.totalorder %v2581_v6, 0  ;;  %v1144_v38 = vshll.u32 %v3137_v13, %v1138_v34  ;;  %v1147_v43 = vshll.u32 %v3138_v15, %v1138_v34  ;;  %v1150_v45 = vshll.u32 %v3139_v22, %v1138_v34 }
 0x184   : > { %2398 = vst [vmem:[%s4320_s8 + $0x20] sm:$0xff] %v2348_v50  ;;  %2406 = vst [vmem:[%s4320_s8 + $0x60] sm:$0xff] %v2380_v27  ;;  %v1401_v9 = vsel %vm2582_vm3, 0, %v2581_v6  ;;  %v1140_v53 = vshrl.u32 %v3136_v11, %v1139_v31  ;;  %v1142_v37 = vshrl.u32 %v3137_v13, %v1139_v31  ;;  %v1145_v57 = vshrl.u32 %v3138_v15, %v1139_v31 }
 0x185   : > { %v1402_v35 = vsub.s32 32, %v1401_v9  ;;  %v1403_v12 = vshll.u32 %v1394_v63, %v1401_v9  ;;  %v1406_v41 = vsub.s32 4294967266, %v1401_v9  ;;  %v1148_v10 = vshrl.u32 %v3139_v22, %v1139_v31 }
 0x186   : > { %v1151_v55 = vshrl.u32 %v3140_v24, %v1139_v31  ;;  %v1143_v0 = vor.u32 %v1142_v37, %v1141_v32  ;;  %v1146_v20 = vor.u32 %v1145_v57, %v1144_v38  ;;  %v1153_v18 = vshll.u32 %v3140_v24, %v1138_v34 }
 0x187   : > { %v1404_v61 = vshrl.u32 %v1386_v5, %v1402_v35  ;;  %v1407_v7 = vadd.s32 127, %v1406_v41  ;;  %v1149_v8 = vor.u32 %v1148_v10, %v1147_v43  ;;  %v1154_v13 = vshrl.u32 %v3141_v30, %v1139_v31 }
 0x188   : > { %v1152_v11 = vor.u32 %v1151_v55, %v1150_v45  ;;  %vm1158_vm7 = vcmp.lt.s32.totalorder %v1137_v21, 3  ;;  %v1160_v15 = vsel %vm1156_vm4, %v1140_v53, %v1143_v0  ;;  %v1164_v47 = vsel %vm1156_vm4, %v1143_v0, %v1146_v20 }
 0x189   : > { %v1405_v28 = vor.u32 %v1404_v61, %v1403_v12  ;;  %v1408_v25 = vshll.u32 %v1407_v7, 23  ;;  %v1161_v16 = vsel %vm1159_vm6, %v1149_v8, 2102212464  ;;  %v1155_v63 = vor.u32 %v1154_v13, %v1153_v18 }
 0x18a   : > { %v1162_v42 = vsel %vm1158_vm7, %v1146_v20, %v1161_v16  ;;  %v1165_v24 = vsel %vm1159_vm6, %v1152_v11, 920167782  ;;  %v1168_v56 = vsel %vm1156_vm4, %v1146_v20, %v1149_v8  ;;  %v478_v40 = vcvt.s32.f32 %v470_v23  ;;  %v2663_v23 = vpop.f32.mrf.mxu0 }
 0x18b   : > { %v1409_v22 = vor.u32 4788187, %v1408_v25  ;;  %v1412_v59 = vcvt.s32.f32 %v1405_v28  ;;  %v1166_v44 = vsel %vm1158_vm7, %v1149_v8, %v1165_v24  ;;  %v1169_v48 = vsel %vm1159_vm6, %v1155_v63, 1326507024  ;;  %v2671_v24 = vpop.f32.mrf.mxu1 }
 0x18c   : > { %v1163_v62 = vsel %vm1157_vm5, %v1160_v15, %v1162_v42  ;;  %v1167_v26 = vsel %vm1157_vm5, %v1164_v47, %v1166_v44  ;;  %v1170_v2 = vsel %vm1158_vm7, %v1152_v11, %v1169_v48  ;;  %v1417_v21 = vsel %vm1332_vm8, %v1416_v1, %v4404_v17 }
 0x18d   : > { %v1410_v30 = vand.u32 2147483647, %v1409_v22  ;;  %v1171_v58 = vsel %vm1157_vm5, %v1168_v56, %v1170_v2  ;;  %v4448_v29 = vmul.u32.u64.low %v4420_v49, %v1167_v26  ;;  %v4449_v39 = vmul.u32.u64.high %v4420_v49, %v1167_v26, %v4448_v29  ;;  %v2913_v38 = vpop.eup %2912 }
 0x18e   : > { %v4453_v4 = vmul.u32.u64.low %v4420_v49, %v1171_v58  ;;  %v4454_v33 = vmul.u32.u64.high %v4420_v49, %v1171_v58, %v4453_v4  ;;  %v1179_v50 = vmul.u32 %v4420_v49, %v1163_v62  ;;  %v486_v46 = vmul.f32 5.9604645e-08, %v478_v40 }
 0x18f   : > { %v1413_v14 = vmul.f32 %v1412_v59, %v1410_v30  ;;  %v1182_v52 = vadd.s32 1, %v4449_v39  ;;  %v1419_v34 = vsel %vm1331_vm10, 0, %v1417_v21  ;;  %v595_v43 = vmul.f32 %v2913_v38, %v4416_v19 }
 0x190   : > { %vm1181_vm11 = vc.u32 %v4454_v33, %v4448_v29  ;;  %v494_v49 = vsub.f32 1.0, %v486_v46  ;;  %v2262_v31 = vadd.s32 3, %v1419_v34  ;;  %v1423_v35 = vand.u32 3, %v1419_v34 }
 0x191   : > { %v1414_v51 = vxor.u32 2147483648, %v1413_v14  ;;  %v1183_v60 = vsel %vm1181_vm11, %v1182_v52, %v4449_v39  ;;  %vm596_vm12 = vcmp.eq.f32.partialorder %v4416_v19, inf  ;;  %vm598_vm13 = vcmp.eq.f32.partialorder %v4416_v19, 0.0 }
 0x192   : > { %v1184_v5 = vadd.s32 %v1183_v60, %v1179_v50  ;;  %v2263_v12 = vand.u32 3, %v2262_v31  ;;  %v599_v57 = vand.u32 2147483648, %v4416_v19  ;;  %vm1428_vm14 = vcmp.eq.s32.totalorder %v1423_v35, 2 }
 0x193   : > { %v1415_v27 = vsel %vm1332_vm8, %v1414_v51, %v1413_v14  ;;  %v597_v7 = vsel %vm596_vm12, %v4416_v19, %v595_v43  ;;  %vm1425_vm15 = vcmp.eq.s32.totalorder %v1423_v35, 0  ;;  %vm1424_vm1 = vcmp.lt.s32.totalorder %v1423_v35, 2 }
 0x194   : > { %v1418_v6 = vsel %vm1331_vm10, %v4246_v36, %v1415_v27  ;;  %v1185_v9 = vadd.s32 536870912, %v1184_v5  ;;  %vm2268_vm9 = vcmp.eq.s32.totalorder %v2263_v12, 2  ;;  %vm2265_vm0 = vcmp.eq.s32.totalorder %v2263_v12, 0 }
 0x195   : > { %2914 = vcosq.f32 %v1418_v6  ;;  %vm2264_vm2 = vcmp.lt.s32.totalorder %v2263_v12, 2  ;;  %vm1422_vm3 = vweird.f32 %v4246_v36  ;;  %v600_v18 = vsel %vm598_vm13, %v599_v57, %v597_v7 }
 0x196   : > { %2916 = vsinq.f32 %v1418_v6  ;;  %v4468_v32 = vshrl.u32 %v1185_v9, 30  ;;  %v1180_v22 = vadd.s32 %v4448_v29, %v4454_v33  ;;  %vm1126_vm5 = vcmp.lt.s32.totalorder %v4398_v54, 0 }
 0x197   : > { %2918 = vlog2.f32 %v494_v49  ;;  %vm1125_vm6 = vcmp.le.f32.partialorder %v1124_v3, 0.7853982 }
 0x198   : > { %v1187_v17 = vshll.u32 %v4468_v32, 30  ;;  %v1210_v50 = vsub.s32 4, %v4468_v32 }
 0x19a   : > { %v1188_v41 = vsub.s32 %v1184_v5, %v1187_v17  ;;  %v1211_v21 = vsel %vm1126_vm5, %v1210_v50, %v4468_v32 }
 0x19b   : > { %v1213_v46 = vsel %vm1125_vm6, 0, %v1211_v21 }
 0x19c   : > { %v1190_v53 = vsub.s32 0, %v1188_v41  ;;  %v2054_v60 = vadd.s32 3, %v1213_v46  ;;  %v1217_v34 = vand.u32 3, %v1213_v46 }
 0x19e   : > { %v2572_v10 = vmin.u32 %v1190_v53, %v1188_v41  ;;  %v2055_v49 = vand.u32 3, %v2054_v60  ;;  %vm1222_vm10 = vcmp.eq.s32.totalorder %v1217_v34, 2  ;;  %vm1219_vm12 = vcmp.eq.s32.totalorder %v1217_v34, 0 }
 0x1a0   : > { %v1192_v0 = vclz %v2572_v10  ;;  %vm2060_vm11 = vcmp.eq.s32.totalorder %v2055_v49, 2  ;;  %vm2057_vm13 = vcmp.eq.s32.totalorder %v2055_v49, 0 }
 0x1a2   : > { %v2915_v37 = vpop.eup %2914  ;;  %v2573_v11 = vadd.s32 4294967294, %v1192_v0  ;;  %v2382_v0 = vpop.f32.mrf.mxu1 }
 0x1a3   : > { %v2917_v61 = vpop.eup %2916  ;;  %v1429_v45 = vxor.u32 2147483648, %v2915_v37 }
 0x1a4   : > { %v1426_v55 = vxor.u32 2147483648, %v2917_v61  ;;  %vm2574_vm4 = vcmp.lt.s32.totalorder %v2573_v11, 0  ;;  %v2919_v59 = vpop.eup %2918 }
 0x1a5   : > { %v1430_v20 = vsel %vm1428_vm14, %v1429_v45, %v2917_v61  ;;  %v2270_v8 = vsel %vm2268_vm9, %v1429_v45, %v2917_v61  ;;  %v1195_v36 = vsel %vm2574_vm4, 0, %v2573_v11  ;;  %v532_v62 = vmul.f32 0.6931472, %v2919_v59 }
 0x1a6   : > { %v1427_v28 = vsel %vm1425_vm15, %v2915_v37, %v1426_v55  ;;  %v2267_v25 = vsel %vm2265_vm0, %v2915_v37, %v1426_v55  ;;  %v1196_v19 = vsub.s32 32, %v1195_v36  ;;  %v1197_v56 = vshll.u32 %v1188_v41, %v1195_v36 }
 0x1a7   : > { %v1431_v13 = vsel %vm1424_vm1, %v1427_v28, %v1430_v20  ;;  %v2271_v15 = vsel %vm2264_vm2, %v2267_v25, %v2270_v8  ;;  %v1200_v30 = vsub.s32 4294967266, %v1195_v36  ;;  %v542_v1 = vmul.f32 -2.0, %v532_v62 }
 0x1a8   : > { %v1432_v16 = vsel %vm1422_vm3, nan, %v1431_v13  ;;  %v2272_v47 = vsel %vm1422_vm3, nan, %v2271_v15  ;;  %v1198_v26 = vshrl.u32 %v1180_v22, %v1196_v19  ;;  %vm1218_vm14 = vcmp.lt.s32.totalorder %v1217_v34, 2 }
 0x1a9   : > { %v1440_v63 = vmul.f32 %v1432_v16, %v600_v18  ;;  %v2280_v42 = vmul.f32 %v2272_v47, %v600_v18  ;;  %v1201_v2 = vadd.s32 127, %v1200_v30  ;;  %2920 = vrsqrt.f32 %v542_v1 }
 0x1aa   : > { %v1199_v29 = vor.u32 %v1198_v26, %v1197_v56  ;;  %vm582_vm7 = vcmp.eq.f32.partialorder %v542_v1, inf  ;;  %vm584_vm8 = vcmp.eq.f32.partialorder %v542_v1, 0.0  ;;  %v585_v3 = vand.u32 2147483648, %v542_v1 }
 0x1ab   : > { %v2288_v44 = vmul.f32 0.1, %v1440_v63  ;;  %v2296_v48 = vmul.f32 0.1, %v2280_v42  ;;  %v1202_v39 = vshll.u32 %v1201_v2, 23  ;;  %vm2056_vm9 = vcmp.lt.s32.totalorder %v2055_v49, 2 }
 0x1ac   : > { %v1206_v4 = vcvt.s32.f32 %v1199_v29  ;;  %vm1216_vm15 = vweird.f32 %v4398_v54 }
 0x1ad   : > { %v2359_v14 = vadd.f32 %v2663_v23, %v2288_v44  ;;  %v2391_v58 = vadd.f32 %v2671_v24, %v2296_v48  ;;  %v1203_v40 = vor.u32 4788187, %v1202_v39 }
 0x1af   : > { %2401 = vst [vmem:[%s4320_s8 + $0x38] sm:$0xff] %v2359_v14  ;;  %2409 = vst [vmem:[%s4320_s8 + $0x78] sm:$0xff] %v2391_v58  ;;  %v1204_v33 = vand.u32 2147483647, %v1203_v40 }
 0x1b1   : > { %v1207_v51 = vmul.f32 %v1206_v4, %v1204_v33 }
 0x1b3   : > { %v1208_v27 = vxor.u32 2147483648, %v1207_v51 }
 0x1b5   : > { %v1209_v52 = vsel %vm1126_vm5, %v1208_v27, %v1207_v51 }
 0x1b6   : > { %v1212_v6 = vsel %vm1125_vm6, %v4398_v54, %v1209_v52  ;;  %v2921_v5 = vpop.eup %2920  ;;  %v2350_v54 = vpop.f32.mrf.mxu0 }
 0x1b7   : > { %2922 = vcosq.f32 %v1212_v6  ;;  %v581_v9 = vmul.f32 %v2921_v5, %v542_v1 }
 0x1b8   : > { %2924 = vsinq.f32 %v1212_v6 }
 0x1b9   : > { %v583_v38 = vsel %vm582_vm7, %v542_v1, %v581_v9 }
 0x1ba   : > { %v586_v43 = vsel %vm584_vm8, %v585_v3, %v583_v38 }
 0x1c4   : > { %v2923_v31 = vpop.eup %2922 }
 0x1c5   : > { %v2925_v32 = vpop.eup %2924  ;;  %v1223_v17 = vxor.u32 2147483648, %v2923_v31 }
 0x1c6   : > { %v1220_v35 = vxor.u32 2147483648, %v2925_v32 }
 0x1c7   : > { %v1224_v12 = vsel %vm1222_vm10, %v1223_v17, %v2925_v32  ;;  %v2062_v41 = vsel %vm2060_vm11, %v1223_v17, %v2925_v32 }
 0x1c8   : > { %v1221_v53 = vsel %vm1219_vm12, %v2923_v31, %v1220_v35  ;;  %v2059_v37 = vsel %vm2057_vm13, %v2923_v31, %v1220_v35 }
 0x1c9   : > { %v1225_v57 = vsel %vm1218_vm14, %v1221_v53, %v1224_v12  ;;  %v2063_v10 = vsel %vm2056_vm9, %v2059_v37, %v2062_v41 }
 0x1ca   : > { %v1226_v61 = vsel %vm1216_vm15, nan, %v1225_v57  ;;  %v2064_v7 = vsel %vm1216_vm15, nan, %v2063_v10 }
 0x1cb   : > { %v1438_v45 = vmul.f32 %v1226_v61, %v586_v43  ;;  %v2278_v55 = vmul.f32 %v2064_v7, %v586_v43 }
 0x1cd   : > { %v2286_v20 = vmul.f32 0.1, %v1438_v45  ;;  %v2294_v8 = vmul.f32 0.1, %v2278_v55 }
 0x1cf   : > { %v2351_v18 = vadd.f32 %v2350_v54, %v2286_v20  ;;  %v2383_v28 = vadd.f32 %v2382_v0, %v2294_v8 }
 0x1d1   : > { %2399 = vst [vmem:[%s4320_s8 + $0x28] sm:$0xff] %v2351_v18  ;;  %2407 = vst [vmem:[%s4320_s8 + $0x68] sm:$0xff] %v2383_v28 }
 0x1d2   : > { %2995 = shalt.err (!%p2992_p0)
}
 0x1d3   : > { %s2996_s12 = scalar_lea.hbm %s4496_s10, 2048  ;;  %s3000_s2 = scalar_lea.hbm %s4582_s3, 8192 }
 0x1d4   : > { %p2997_p1 = scmp.ne.s32.totalorder %s4496_s10, %s2996_s12  ;;  %p3001_p6 = scmp.lt.s32.totalorder %s4496_s10, %s4582_s3 }
 0x1d5   : > { %p3002_p4 = scmp.lt.s32.totalorder %s3000_s2, %s2996_s12 }
 0x1d6   : > { %p2998_p3 = pnand %p2997_p1, %p4630_p8 }
 0x1d7   : > { %p3003_p9 = por %p3002_p4, %p3001_p6 }
 0x1d8   : > { %p2999_p5 = pneg %p2998_p3 }
 0x1da   : > { %p3004_p7 = pnand %p3003_p9, %p2999_p5 }
 0x1dc   : > { %3007 = shalt.err (!%p3004_p7)
}
 0x1dd   : > { %s3143_s1 = smov 128   ;;  %s3144_s4 = smov 256  }
 0x1de   : > { %s3145_s22 = smov 8  }
 0x1df   : > { %2724 = dma.vmem_to_hbm [thread:$0]  (%p4630_p8), %s4498_s7, 2048, %s4496_s10, %s4504_s25, %s3143_s1, %s3144_s4, %s3145_s22  }
 0x1e0 PF: > { %p2738_p12 = scmp.ge.s32.totalorder %s3130_s26, 2  ;;  %s2441_s23 = sand.u32 1, %s3078_s14  }
 0x1e1   : > { %p4631_p10 = scmp.ne.s32.totalorder %s4611_s24, 0  ;;  %s2442_s17 = scalar_lea.sflag [#allocation6], %s2441_s23 }
 0x1e3   : > { %p2734_p11 = pnand %p2738_p12, %p4631_p10 }
 0x1e5   : > { %p2735_p13 = pneg %p2734_p11 }
 0x1e7   : > { %3073 = dma.done.wait (%p2735_p13), %s2442_s17, 2048  }
 0x1e8   : > { %3075 = vsyncadd (%p2735_p13), %s2442_s17, 4294965248  ;;  %s23_s26 = sadd.s32 1, %s3130_s26   ;;  %s4633_s24 = sld [smem:[#allocation16_spill]] }
 0x1e9   : > { %p4532_p2 = scmp.ge.s32.totalorder %s23_s26, 6   ;;  %s4634_s22 = sld [smem:[#allocation13_spill]] }
 0x1ea   : > { %s4635_s23 = sld [smem:[#allocation14_spill]]  ;;  %s4638_s14 = smov %s3082_s15 }
 0x1eb   : > { %s4636_s11 = sld [smem:[#allocation15_spill]]  ;;  %s4639_s15 = smov %s3086_s16 }
 0x1ec   : > { %s4637_s25 = sld [smem:[#allocation17_spill]]  ;;  %s4640_s16 = smov %s3343_s5 }
 0x1ed   : > { %s4641_s17 = smov %s3094_s18  ;;  %s4642_s18 = smov %s3098_s19 }
 0x1ee   : > { %s4643_s19 = smov %s3340_s9  ;;  %s4644_s20 = smov %s3106_s0 }
 0x1ef   : > { %s4645_s0 = smov %s3110_s21  ;;  %s4646_s21 = smov %s4633_s24 }
 0x1f0   :  { %22 = sbr.rel (!%p4532_p2) target bundleno = 16 (0x10), region = 86 }
 0x1f1   : > { %s4647_s24 = smov %s4636_s11 }
 0x1f5   :  { %2447 = vsyncpa [#allocation5], 1 }
 0x1f6   :  { %2449 = vsyncpa [#allocation5 + $0x1], 1 }
 0x1f7   :  { %2450 = vsyncpa [#allocation8], 1 }
 0x1f8   :  { %2452 = vsyncpa [#allocation8 + $0x1], 1 }
 0x1f9   :  { %2453 = vsyncpa [#allocation6], 1 }
 0x1fa   :  { %2455 = vsyncpa [#allocation6 + $0x1], 1 }

</bundles_post_ra>
